<compile_context>
chip_gen: v7x
topology: tpu7x:2x2x1
jax: 0.10.0
libtpu: 0.0.40
codegen_flags: <defaults>
</compile_context>

<pallas_src>
import jax
import jax.numpy as jnp
from jax.experimental import pallas as pl
from jax.experimental.pallas import tpu as pltpu

# ---- small synthetic "bert-base-uncased"-like config (scaled down) ----
B = 2            # batch
S = 8            # sequence length
H = 32           # hidden size
NH = 2           # attention heads
HD = H // NH     # head dim
I = 64           # FFN intermediate size (logical)
IPAD = 128       # FFN intermediate size padded to a full lane tile
L = 2            # transformer layers
V = 64           # vocab size
N_CLASSES = 3    # n_classes of the classifier head
N_PAD = 128      # lane-dense padded width for the classifier output
LN_EPS = 1e-12   # BERT layernorm eps


# ---------------- in-kernel helpers (all f32 elementwise, v5e-safe) ----------------
def _layernorm(x, g, b):
    mu = jnp.mean(x, axis=-1, keepdims=True)
    var = jnp.mean((x - mu) ** 2, axis=-1, keepdims=True)
    return (x - mu) * jax.lax.rsqrt(var + LN_EPS) * g + b


def _gelu(y):
    # TODO(synk): HF BERT uses erf-GELU; tanh approximation is numerically close.
    c = 0.7978845608028654  # sqrt(2/pi)
    return 0.5 * y * (1.0 + jnp.tanh(c * (y + 0.044715 * y * y * y)))


# ---------------- fused model kernel ----------------
def fused_encoder_kernel(emb_ref, mask_ref,
                         emb_ln_g_ref, emb_ln_b_ref,
                         wqkv_ref, bqkv_ref, wo_ref, bo_ref,
                         ln1_g_ref, ln1_b_ref,
                         w1_ref, b1_ref, w2_ref, b2_ref,
                         ln2_g_ref, ln2_b_ref,
                         pool_w_ref, pool_b_ref, out_w_ref, out_b_ref,
                         logits_ref, x_scr):
    """Grid = (layers,), sequential ('arbitrary'). Activation x (B*S, H) stays in VMEM."""
    layer = pl.program_id(0)
    n_layers = pl.num_programs(0)
    bf16 = jnp.bfloat16

    Bk, Sk, Hk = emb_ref.shape
    _, nh, hd, _ = wo_ref.shape
    scale = 1.0 / (hd ** 0.5)

    # Embedding LayerNorm once (first layer step).
    @pl.when(layer == 0)
    def _init():
        emb = emb_ref[...].reshape(Bk * Sk, Hk)
        x_scr[...] = _layernorm(emb, emb_ln_g_ref[...], emb_ln_b_ref[...])

    x = x_scr[...]                      # (B*S, H) f32, VMEM-resident across layers
    x_bf = x.astype(bf16)
    bias = mask_ref[...]                # (B, 1, S) additive mask bias ((1-mask)*-1e4)

    wqkv = wqkv_ref[0]                  # (3*NH, H, HD) bf16, heads pre-split (no lane slicing)
    bqkv = bqkv_ref[0]                  # (3*NH, 1, HD) f32
    wo = wo_ref[0]                      # (NH, HD, H)  bf16

    # ---- self-attention: per-head projections, accumulate output proj over heads ----
    attn = jnp.zeros((Bk * Sk, Hk), jnp.float32)
    for h in range(nh):
        q = jnp.dot(x_bf, wqkv[h], preferred_element_type=jnp.float32) + bqkv[h]
        k = jnp.dot(x_bf, wqkv[nh + h], preferred_element_type=jnp.float32) + bqkv[nh + h]
        v = jnp.dot(x_bf, wqkv[2 * nh + h], preferred_element_type=jnp.float32) + bqkv[2 * nh + h]
        q3 = q.reshape(Bk, Sk, hd).astype(bf16)
        k3 = k.reshape(Bk, Sk, hd).astype(bf16)
        v3 = v.reshape(Bk, Sk, hd).astype(bf16)
        s = jnp.einsum('bqd,bkd->bqk', q3, k3,
                       preferred_element_type=jnp.float32) * scale     # (B, S, S)
        s = s + bias
        s = s - jnp.max(s, axis=-1, keepdims=True)
        p = jnp.exp(s)
        # TODO(synk): approx reciprocal (~1e-3 rel err); set approx=False for strict parity.
        p = p * pl.reciprocal(jnp.sum(p, axis=-1, keepdims=True), approx=True)
        ctx = jnp.einsum('bqk,bkd->bqd', p.astype(bf16), v3,
                         preferred_element_type=jnp.float32)            # (B, S, HD)
        attn = attn + jnp.dot(ctx.reshape(Bk * Sk, hd).astype(bf16), wo[h],
                              preferred_element_type=jnp.float32)
    attn = attn + bo_ref[0]

    # fused residual + LayerNorm
    x = _layernorm(x + attn, ln1_g_ref[0], ln1_b_ref[0])

    # ---- feed-forward (I padded to 128 lanes) + fused residual + LayerNorm ----
    ff = jnp.dot(x.astype(bf16), w1_ref[0], preferred_element_type=jnp.float32) + b1_ref[0]
    ff = _gelu(ff)
    ff = jnp.dot(ff.astype(bf16), w2_ref[0], preferred_element_type=jnp.float32) + b2_ref[0]
    x = _layernorm(x + ff, ln2_g_ref[0], ln2_b_ref[0])
    x_scr[...] = x

    # ---- pooler + classifier head at the last layer (lane-dense 128-wide output) ----
    @pl.when(layer == n_layers - 1)
    def _head():
        cls = x.reshape(Bk, Sk, Hk)[:, 0, :]                 # (B, H) [CLS] tokens
        pooled = jnp.tanh(jnp.dot(cls.astype(bf16), pool_w_ref[...],
                                  preferred_element_type=jnp.float32) + pool_b_ref[...])
        # TODO(synk): nn.Dropout(p=0.3) is identity in eval mode (training-mode dropout
        # via pltpu.prng_random_bits not implemented).
        logits_ref[...] = (jnp.dot(pooled.astype(bf16), out_w_ref[...],
                                   preferred_element_type=jnp.float32)
                           + out_b_ref[...])                 # (B, N_PAD)


# ---------------- parameters (deterministic synthetic init) ----------------
def init_params(key):
    keys = iter(jax.random.split(key, 64))

    def w(shape, scale=0.02):
        return (scale * jax.random.normal(next(keys), shape)).astype(jnp.float32)

    def zeros(shape):
        return jnp.zeros(shape, jnp.float32)

    def ones(shape):
        return jnp.ones(shape, jnp.float32)

    params = {
        "tok_emb": w((V, H)),
        "pos_emb": w((S, H)),
        "type_emb": w((2, H)),
        "emb_ln_g": ones((H,)), "emb_ln_b": zeros((H,)),
        "layers": [],
        "pool_w": w((H, H)), "pool_b": zeros((H,)),
        "out_w": w((H, N_CLASSES)), "out_b": zeros((N_CLASSES,)),
    }
    for _ in range(L):
        params["layers"].append({
            "wq": w((H, H)), "bq": zeros((H,)),
            "wk": w((H, H)), "bk": zeros((H,)),
            "wv": w((H, H)), "bv": zeros((H,)),
            "wo": w((H, H)), "bo": zeros((H,)),
            "ln1_g": ones((H,)), "ln1_b": zeros((H,)),
            "w1": w((H, I)), "b1": zeros((I,)),
            "w2": w((I, H)), "b2": zeros((H,)),
            "ln2_g": ones((H,)), "ln2_b": zeros((H,)),
        })
    return params


def prepare_fused_params(params):
    """Stack per-layer weights on a leading layer axis; pre-split heads; pad FFN to 128."""
    Ls = params["layers"]
    bf16 = jnp.bfloat16

    def split_heads_cols(w):   # (H, H) -> (NH, H, HD)
        return jnp.stack([w[:, h * HD:(h + 1) * HD] for h in range(NH)])

    def split_heads_bias(b):   # (H,) -> (NH, 1, HD)
        return jnp.stack([b[h * HD:(h + 1) * HD][None, :] for h in range(NH)])

    wqkv = jnp.stack([jnp.concatenate([split_heads_cols(lp["wq"]),
                                       split_heads_cols(lp["wk"]),
                                       split_heads_cols(lp["wv"])], axis=0)
                      for lp in Ls]).astype(bf16)                        # (L, 3*NH, H, HD)
    bqkv = jnp.stack([jnp.concatenate([split_heads_bias(lp["bq"]),
                                       split_heads_bias(lp["bk"]),
                                       split_heads_bias(lp["bv"])], axis=0)
                      for lp in Ls])                                     # (L, 3*NH, 1, HD)
    wo = jnp.stack([jnp.stack([lp["wo"][h * HD:(h + 1) * HD, :] for h in range(NH)])
                    for lp in Ls]).astype(bf16)                          # (L, NH, HD, H)
    bo = jnp.stack([lp["bo"][None, :] for lp in Ls])                     # (L, 1, H)
    ln1_g = jnp.stack([lp["ln1_g"][None, :] for lp in Ls])
    ln1_b = jnp.stack([lp["ln1_b"][None, :] for lp in Ls])
    # FFN padded to IPAD=128 lanes; GELU(0)=0 so padding is exact.
    w1 = jnp.stack([jnp.zeros((H, IPAD), jnp.float32).at[:, :I].set(lp["w1"])
                    for lp in Ls]).astype(bf16)                          # (L, H, 128)
    b1 = jnp.stack([jnp.zeros((1, IPAD), jnp.float32).at[0, :I].set(lp["b1"])
                    for lp in Ls])                                       # (L, 1, 128)
    w2 = jnp.stack([jnp.zeros((IPAD, H), jnp.float32).at[:I, :].set(lp["w2"])
                    for lp in Ls]).astype(bf16)                          # (L, 128, H)
    b2 = jnp.stack([lp["b2"][None, :] for lp in Ls])                     # (L, 1, H)
    ln2_g = jnp.stack([lp["ln2_g"][None, :] for lp in Ls])
    ln2_b = jnp.stack([lp["ln2_b"][None, :] for lp in Ls])

    out_w = (jnp.zeros((H, N_PAD), jnp.float32)
             .at[:, :N_CLASSES].set(params["out_w"])).astype(bf16)       # (H, 128)
    out_b = jnp.zeros((1, N_PAD), jnp.float32).at[0, :N_CLASSES].set(params["out_b"])

    return {
        "tok_emb": params["tok_emb"], "pos_emb": params["pos_emb"],
        "type_emb": params["type_emb"],
        "emb_ln_g": params["emb_ln_g"][None, :], "emb_ln_b": params["emb_ln_b"][None, :],
        "wqkv": wqkv, "bqkv": bqkv, "wo": wo, "bo": bo,
        "ln1_g": ln1_g, "ln1_b": ln1_b,
        "w1": w1, "b1": b1, "w2": w2, "b2": b2,
        "ln2_g": ln2_g, "ln2_b": ln2_b,
        "pool_w": params["pool_w"].astype(bf16), "pool_b": params["pool_b"][None, :],
        "out_w": out_w, "out_b": out_b,
    }


# ---------------- forward (mirrors SentimentClassifier.forward, eval mode) ----------------
def sentiment_classifier_forward(fp, input_ids, attention_mask):
    Bsz, Sq = input_ids.shape
    n_layers, _, hidden, hd = fp["wqkv"].shape[0], None, fp["pool_w"].shape[0], fp["wo"].shape[2]
    nh = fp["wo"].shape[1]
    ipad = fp["w1"].shape[-1]

    # BERT embeddings (token + position + token_type[=0]); gather stays in XLA.
    # TODO(synk): at real BERT size, move the gather in-kernel via PrefetchScalarGridSpec.
    tok = jnp.take(fp["tok_emb"], input_ids, axis=0)                  # (B, S, H)
    pos = fp["pos_emb"][None, :Sq, :]
    typ = fp["type_emb"][0][None, None, :]   # TODO(synk): token_type_ids hard-coded to 0.
    emb = (tok + pos + typ).astype(jnp.float32)                       # (B, S, H)

    # extended attention mask: (1 - mask) * -1e4, shape (B, 1, S)
    mask_bias = ((1.0 - attention_mask.astype(jnp.float32)) * -1e4).reshape(Bsz, 1, Sq)

    fixed2 = lambda shape: pl.BlockSpec(shape, lambda l: (0, 0))
    fixed3 = lambda shape: pl.BlockSpec(shape, lambda l: (0, 0, 0))
    layer3 = lambda shape: pl.BlockSpec(shape, lambda l: (l, 0, 0))
    layer4 = lambda shape: pl.BlockSpec(shape, lambda l: (l, 0, 0, 0))

    weight_keys = ("emb_ln_g", "emb_ln_b", "wqkv", "bqkv", "wo", "bo",
                   "ln1_g", "ln1_b", "w1", "b1", "w2", "b2",
                   "ln2_g", "ln2_b", "pool_w", "pool_b", "out_w", "out_b")
    cost = pl.CostEstimate(
        flops=int(2 * n_layers * Bsz * Sq
                  * (3 * hidden * hidden + 2 * Sq * hidden + hidden * hidden
                     + 2 * hidden * ipad)
                  + 2 * Bsz * (hidden * hidden + hidden * N_PAD)),
        transcendentals=int(n_layers * Bsz * (nh * Sq * Sq + Sq * ipad) + Bsz * hidden),
        bytes_accessed=int(emb.size * 4 + mask_bias.size * 4 + Bsz * N_PAD * 4
                           + sum(int(fp[k].size) * fp[k].dtype.itemsize
                                 for k in weight_keys)))

    out = pl.pallas_call(
        fused_encoder_kernel,
        out_shape=jax.ShapeDtypeStruct((Bsz, N_PAD), jnp.float32),
        grid=(n_layers,),
        in_specs=[
            fixed3((Bsz, Sq, hidden)),          # emb            (whole batch in one block)
            fixed3((Bsz, 1, Sq)),               # mask bias
            fixed2((1, hidden)),                # emb_ln_g
            fixed2((1, hidden)),                # emb_ln_b
            layer4((1, 3 * nh, hidden, hd)),    # wqkv (per-head split)
            layer4((1, 3 * nh, 1, hd)),         # bqkv
            layer4((1, nh, hd, hidden)),        # wo   (per-head split)
            layer3((1, 1, hidden)),             # bo
            layer3((1, 1, hidden)),             # ln1_g
            layer3((1, 1, hidden)),             # ln1_b
            layer3((1, hidden, ipad)),          # w1 (lane-dense, padded to 128)
            layer3((1, 1, ipad)),               # b1
            layer3((1, ipad, hidden)),          # w2
            layer3((1, 1, hidden)),             # b2
            layer3((1, 1, hidden)),             # ln2_g
            layer3((1, 1, hidden)),             # ln2_b
            fixed2((hidden, hidden)),           # pool_w
            fixed2((1, hidden)),                # pool_b
            fixed2((hidden, N_PAD)),            # out_w (lane-dense padded)
            fixed2((1, N_PAD)),                 # out_b (lane-dense padded)
        ],
        out_specs=pl.BlockSpec((Bsz, N_PAD), lambda l: (0, 0)),
        scratch_shapes=[pltpu.VMEM((Bsz * Sq, hidden), jnp.float32)],  # resident activation
        compiler_params=pltpu.CompilerParams(dimension_semantics=("arbitrary",)),
        cost_estimate=cost,
    )(emb, mask_bias,
      fp["emb_ln_g"], fp["emb_ln_b"],
      fp["wqkv"], fp["bqkv"], fp["wo"], fp["bo"], fp["ln1_g"], fp["ln1_b"],
      fp["w1"], fp["b1"], fp["w2"], fp["b2"], fp["ln2_g"], fp["ln2_b"],
      fp["pool_w"], fp["pool_b"], fp["out_w"], fp["out_b"])

    return out[:, :N_CLASSES]                                          # (B, N_CLASSES)


if __name__ == "__main__":
    key = jax.random.PRNGKey(0)
    pkey, ikey = jax.random.split(key)
    params = init_params(pkey)
    fused_params = prepare_fused_params(params)

    input_ids = jax.random.randint(ikey, (B, S), 0, V, dtype=jnp.int32)
    attention_mask = jnp.ones((B, S), jnp.int32).at[1, 6:].set(0)  # second example padded

    forward = jax.jit(sentiment_classifier_forward)
    logits = forward(fused_params, input_ids, attention_mask)
    jax.block_until_ready(logits)
    assert logits.shape == (B, N_CLASSES) and logits.dtype == jnp.float32
    print("KERNEL_OK")
</pallas_src>

<mosaic_0001>
module attributes {stable_mosaic.version = 11 : i64} {
  func.func @fused_encoder_kernel(%arg0: i32, %arg1: memref<2x8x32xf32, #tpu.memory_space<vmem>>, %arg2: memref<2x1x8xf32, #tpu.memory_space<vmem>>, %arg3: memref<1x32xf32, #tpu.memory_space<vmem>>, %arg4: memref<1x32xf32, #tpu.memory_space<vmem>>, %arg5: memref<1x6x32x16xbf16, #tpu.memory_space<vmem>>, %arg6: memref<1x6x1x16xf32, #tpu.memory_space<vmem>>, %arg7: memref<1x2x16x32xbf16, #tpu.memory_space<vmem>>, %arg8: memref<1x1x32xf32, #tpu.memory_space<vmem>>, %arg9: memref<1x1x32xf32, #tpu.memory_space<vmem>>, %arg10: memref<1x1x32xf32, #tpu.memory_space<vmem>>, %arg11: memref<1x32x128xbf16, #tpu.memory_space<vmem>>, %arg12: memref<1x1x128xf32, #tpu.memory_space<vmem>>, %arg13: memref<1x128x32xbf16, #tpu.memory_space<vmem>>, %arg14: memref<1x1x32xf32, #tpu.memory_space<vmem>>, %arg15: memref<1x1x32xf32, #tpu.memory_space<vmem>>, %arg16: memref<1x1x32xf32, #tpu.memory_space<vmem>>, %arg17: memref<32x32xbf16, #tpu.memory_space<vmem>>, %arg18: memref<1x32xf32, #tpu.memory_space<vmem>>, %arg19: memref<32x128xbf16, #tpu.memory_space<vmem>>, %arg20: memref<1x128xf32, #tpu.memory_space<vmem>>, %arg21: memref<2x128xf32, #tpu.memory_space<vmem>>, %arg22: memref<16x32xf32, #tpu.memory_space<vmem>>) attributes {dimension_semantics = [#tpu.dimension_semantics<arbitrary>], iteration_bounds = array<i64: 2>, scalar_prefetch = 0 : i64, scratch_operands = 1 : i64, tpu.core_type = #tpu.core_type<tc>, window_params = [{pipeline_mode = #tpu.pipeline_mode<synchronous>, transform_indices = @transform_0, window_bounds = array<i64: 2, 8, 32>}, {pipeline_mode = #tpu.pipeline_mode<synchronous>, transform_indices = @transform_1, window_bounds = array<i64: 2, 1, 8>}, {pipeline_mode = #tpu.pipeline_mode<synchronous>, transform_indices = @transform_2, window_bounds = array<i64: 1, 32>}, {pipeline_mode = #tpu.pipeline_mode<synchronous>, transform_indices = @transform_3, window_bounds = array<i64: 1, 32>}, {transform_indices = @transform_4, window_bounds = array<i64: 1, 6, 32, 16>}, {transform_indices = @transform_5, window_bounds = array<i64: 1, 6, 1, 16>}, {transform_indices = @transform_6, window_bounds = array<i64: 1, 2, 16, 32>}, {transform_indices = @transform_7, window_bounds = array<i64: 1, 1, 32>}, {transform_indices = @transform_8, window_bounds = array<i64: 1, 1, 32>}, {transform_indices = @transform_9, window_bounds = array<i64: 1, 1, 32>}, {transform_indices = @transform_10, window_bounds = array<i64: 1, 32, 128>}, {transform_indices = @transform_11, window_bounds = array<i64: 1, 1, 128>}, {transform_indices = @transform_12, window_bounds = array<i64: 1, 128, 32>}, {transform_indices = @transform_13, window_bounds = array<i64: 1, 1, 32>}, {transform_indices = @transform_14, window_bounds = array<i64: 1, 1, 32>}, {transform_indices = @transform_15, window_bounds = array<i64: 1, 1, 32>}, {pipeline_mode = #tpu.pipeline_mode<synchronous>, transform_indices = @transform_16, window_bounds = array<i64: 32, 32>}, {pipeline_mode = #tpu.pipeline_mode<synchronous>, transform_indices = @transform_17, window_bounds = array<i64: 1, 32>}, {pipeline_mode = #tpu.pipeline_mode<synchronous>, transform_indices = @transform_18, window_bounds = array<i64: 32, 128>}, {pipeline_mode = #tpu.pipeline_mode<synchronous>, transform_indices = @transform_19, window_bounds = array<i64: 1, 128>}, {pipeline_mode = #tpu.pipeline_mode<synchronous>, transform_indices = @transform_20, window_bounds = array<i64: 2, 128>}]} {
    %c0_i32 = arith.constant 0 : i32
    %0 = arith.cmpi eq, %arg0, %c0_i32 : i32
    %1 = arith.extui %0 : i1 to i32
    %c0_i32_0 = arith.constant 0 : i32
    %2 = arith.cmpi ne, %1, %c0_i32_0 : i32
    scf.if %2 {
      %c0_81 = arith.constant 0 : index
      %c0_82 = arith.constant 0 : index
      %c0_83 = arith.constant 0 : index
      %204 = vector.load %arg1[%c0_81, %c0_82, %c0_83] : memref<2x8x32xf32, #tpu.memory_space<vmem>>, vector<2x8x32xf32>
      %205 = vector.shape_cast %204 : vector<2x8x32xf32> to vector<16x32xf32>
      %c0_84 = arith.constant 0 : index
      %c0_85 = arith.constant 0 : index
      %206 = vector.load %arg3[%c0_84, %c0_85] : memref<1x32xf32, #tpu.memory_space<vmem>>, vector<1x32xf32>
      %c0_86 = arith.constant 0 : index
      %c0_87 = arith.constant 0 : index
      %207 = vector.load %arg4[%c0_86, %c0_87] : memref<1x32xf32, #tpu.memory_space<vmem>>, vector<1x32xf32>
      %cst_88 = arith.constant dense<0.000000e+00> : vector<16xf32>
      %208 = vector.multi_reduction <add>, %205, %cst_88 [1] : vector<16x32xf32> to vector<16xf32>
      %209 = vector.shape_cast %208 : vector<16xf32> to vector<16x1xf32>
      %cst_89 = arith.constant 3.200000e+01 : f32
      %210 = vector.broadcast %cst_89 : f32 to vector<16x1xf32>
      %211 = arith.divf %209, %210 : vector<16x1xf32>
      %212 = vector.broadcast %211 : vector<16x1xf32> to vector<16x32xf32>
      %213 = arith.subf %205, %212 : vector<16x32xf32>
      %214 = arith.mulf %213, %213 : vector<16x32xf32>
      %cst_90 = arith.constant dense<0.000000e+00> : vector<16xf32>
      %215 = vector.multi_reduction <add>, %214, %cst_90 [1] : vector<16x32xf32> to vector<16xf32>
      %216 = vector.shape_cast %215 : vector<16xf32> to vector<16x1xf32>
      %cst_91 = arith.constant 3.200000e+01 : f32
      %217 = vector.broadcast %cst_91 : f32 to vector<16x1xf32>
      %218 = arith.divf %216, %217 : vector<16x1xf32>
      %219 = vector.broadcast %211 : vector<16x1xf32> to vector<16x32xf32>
      %220 = arith.subf %205, %219 : vector<16x32xf32>
      %cst_92 = arith.constant 9.99999996E-13 : f32
      %221 = vector.broadcast %cst_92 : f32 to vector<16x1xf32>
      %222 = arith.addf %218, %221 : vector<16x1xf32>
      %223 = math.rsqrt %222 : vector<16x1xf32>
      %224 = vector.broadcast %223 : vector<16x1xf32> to vector<16x32xf32>
      %225 = arith.mulf %220, %224 : vector<16x32xf32>
      %226 = vector.broadcast %206 : vector<1x32xf32> to vector<16x32xf32>
      %227 = arith.mulf %225, %226 : vector<16x32xf32>
      %228 = vector.broadcast %207 : vector<1x32xf32> to vector<16x32xf32>
      %229 = arith.addf %227, %228 : vector<16x32xf32>
      %c0_93 = arith.constant 0 : index
      %c0_94 = arith.constant 0 : index
      %230 = vector.load %arg22[%c0_93, %c0_94] : memref<16x32xf32, #tpu.memory_space<vmem>>, vector<16x32xf32>
      tpu.vector_store %arg22[%c0_93, %c0_94], %229 {strides = array<i32>} : memref<16x32xf32, #tpu.memory_space<vmem>>, vector<16x32xf32>,
    } else {
    }
    %c0 = arith.constant 0 : index
    %c0_1 = arith.constant 0 : index
    %3 = vector.load %arg22[%c0, %c0_1] : memref<16x32xf32, #tpu.memory_space<vmem>>, vector<16x32xf32>
    %4 = arith.truncf %3 : vector<16x32xf32> to vector<16x32xbf16>
    %c0_2 = arith.constant 0 : index
    %c0_3 = arith.constant 0 : index
    %c0_4 = arith.constant 0 : index
    %5 = vector.load %arg2[%c0_2, %c0_3, %c0_4] : memref<2x1x8xf32, #tpu.memory_space<vmem>>, vector<2x1x8xf32>
    %c0_5 = arith.constant 0 : index
    %c0_6 = arith.constant 0 : index
    %c0_7 = arith.constant 0 : index
    %c0_8 = arith.constant 0 : index
    %6 = vector.load %arg5[%c0_5, %c0_6, %c0_7, %c0_8] : memref<1x6x32x16xbf16, #tpu.memory_space<vmem>>, vector<1x6x32x16xbf16>
    %7 = vector.shape_cast %6 : vector<1x6x32x16xbf16> to vector<6x32x16xbf16>
    %c0_9 = arith.constant 0 : index
    %c0_10 = arith.constant 0 : index
    %c0_11 = arith.constant 0 : index
    %c0_12 = arith.constant 0 : index
    %8 = vector.load %arg6[%c0_9, %c0_10, %c0_11, %c0_12] : memref<1x6x1x16xf32, #tpu.memory_space<vmem>>, vector<1x6x1x16xf32>
    %9 = vector.shape_cast %8 : vector<1x6x1x16xf32> to vector<6x1x16xf32>
    %c0_13 = arith.constant 0 : index
    %c0_14 = arith.constant 0 : index
    %c0_15 = arith.constant 0 : index
    %c0_16 = arith.constant 0 : index
    %10 = vector.load %arg7[%c0_13, %c0_14, %c0_15, %c0_16] : memref<1x2x16x32xbf16, #tpu.memory_space<vmem>>, vector<1x2x16x32xbf16>
    %11 = vector.shape_cast %10 : vector<1x2x16x32xbf16> to vector<2x16x32xbf16>
    %cst = arith.constant 0.000000e+00 : f32
    %12 = vector.broadcast %cst : f32 to vector<16x32xf32>
    %13 = vector.extract_strided_slice %7 {offsets = [0, 0, 0], sizes = [1, 32, 16], strides = [1, 1, 1]} : vector<6x32x16xbf16> to vector<1x32x16xbf16>
    %14 = vector.shape_cast %13 : vector<1x32x16xbf16> to vector<32x16xbf16>
    %cst_17 = arith.constant dense<0.000000e+00> : vector<16x16xf32>
    %15 = tpu.matmul %4, %14, %cst_17 {dimension_numbers = #tpu.dot_dimension_numbers<[1], [0], [0], [1], [0, 0, 1, 1], [], []>} : vector<16x32xbf16>, vector<32x16xbf16>, vector<16x16xf32> -> vector<16x16xf32>
    %16 = vector.extract_strided_slice %9 {offsets = [0, 0, 0], sizes = [1, 1, 16], strides = [1, 1, 1]} : vector<6x1x16xf32> to vector<1x1x16xf32>
    %17 = vector.shape_cast %16 : vector<1x1x16xf32> to vector<1x16xf32>
    %18 = vector.broadcast %17 : vector<1x16xf32> to vector<16x16xf32>
    %19 = arith.addf %15, %18 : vector<16x16xf32>
    %20 = vector.extract_strided_slice %7 {offsets = [2, 0, 0], sizes = [1, 32, 16], strides = [1, 1, 1]} : vector<6x32x16xbf16> to vector<1x32x16xbf16>
    %21 = vector.shape_cast %20 : vector<1x32x16xbf16> to vector<32x16xbf16>
    %cst_18 = arith.constant dense<0.000000e+00> : vector<16x16xf32>
    %22 = tpu.matmul %4, %21, %cst_18 {dimension_numbers = #tpu.dot_dimension_numbers<[1], [0], [0], [1], [0, 0, 1, 1], [], []>} : vector<16x32xbf16>, vector<32x16xbf16>, vector<16x16xf32> -> vector<16x16xf32>
    %23 = vector.extract_strided_slice %9 {offsets = [2, 0, 0], sizes = [1, 1, 16], strides = [1, 1, 1]} : vector<6x1x16xf32> to vector<1x1x16xf32>
    %24 = vector.shape_cast %23 : vector<1x1x16xf32> to vector<1x16xf32>
    %25 = vector.broadcast %24 : vector<1x16xf32> to vector<16x16xf32>
    %26 = arith.addf %22, %25 : vector<16x16xf32>
    %27 = vector.extract_strided_slice %7 {offsets = [4, 0, 0], sizes = [1, 32, 16], strides = [1, 1, 1]} : vector<6x32x16xbf16> to vector<1x32x16xbf16>
    %28 = vector.shape_cast %27 : vector<1x32x16xbf16> to vector<32x16xbf16>
    %cst_19 = arith.constant dense<0.000000e+00> : vector<16x16xf32>
    %29 = tpu.matmul %4, %28, %cst_19 {dimension_numbers = #tpu.dot_dimension_numbers<[1], [0], [0], [1], [0, 0, 1, 1], [], []>} : vector<16x32xbf16>, vector<32x16xbf16>, vector<16x16xf32> -> vector<16x16xf32>
    %30 = vector.extract_strided_slice %9 {offsets = [4, 0, 0], sizes = [1, 1, 16], strides = [1, 1, 1]} : vector<6x1x16xf32> to vector<1x1x16xf32>
    %31 = vector.shape_cast %30 : vector<1x1x16xf32> to vector<1x16xf32>
    %32 = vector.broadcast %31 : vector<1x16xf32> to vector<16x16xf32>
    %33 = arith.addf %29, %32 : vector<16x16xf32>
    %34 = vector.shape_cast %19 : vector<16x16xf32> to vector<2x8x16xf32>
    %35 = arith.truncf %34 : vector<2x8x16xf32> to vector<2x8x16xbf16>
    %36 = vector.shape_cast %26 : vector<16x16xf32> to vector<2x8x16xf32>
    %37 = arith.truncf %36 : vector<2x8x16xf32> to vector<2x8x16xbf16>
    %38 = vector.shape_cast %33 : vector<16x16xf32> to vector<2x8x16xf32>
    %39 = arith.truncf %38 : vector<2x8x16xf32> to vector<2x8x16xbf16>
    "tpu.trace_start"() <{level = 10 : i32, message = "bqd,bkd->bqk"}> : () -> ()
    %cst_20 = arith.constant dense<0.000000e+00> : vector<2x8x8xf32>
    %40 = tpu.matmul %35, %37, %cst_20 {dimension_numbers = #tpu.dot_dimension_numbers<[2], [2], [1], [1], [0, 0, 0, 1, 1, 1], [0], [0]>} : vector<2x8x16xbf16>, vector<2x8x16xbf16>, vector<2x8x8xf32> -> vector<2x8x8xf32>
    "tpu.trace_stop"() : () -> ()
    %cst_21 = arith.constant 2.500000e-01 : f32
    %41 = vector.broadcast %cst_21 : f32 to vector<2x8x8xf32>
    %42 = arith.mulf %40, %41 : vector<2x8x8xf32>
    %43 = vector.broadcast %5 : vector<2x1x8xf32> to vector<2x8x8xf32>
    %44 = arith.addf %42, %43 : vector<2x8x8xf32>
    %cst_22 = arith.constant dense<0xFF800000> : vector<2x8xf32>
    %45 = vector.multi_reduction <maximumf>, %44, %cst_22 [2] : vector<2x8x8xf32> to vector<2x8xf32>
    %46 = vector.shape_cast %45 : vector<2x8xf32> to vector<2x8x1xf32>
    %47 = vector.broadcast %46 : vector<2x8x1xf32> to vector<2x8x8xf32>
    %48 = arith.subf %44, %47 : vector<2x8x8xf32>
    %49 = math.exp %48 : vector<2x8x8xf32>
    %cst_23 = arith.constant dense<0.000000e+00> : vector<2x8xf32>
    %50 = vector.multi_reduction <add>, %49, %cst_23 [2] : vector<2x8x8xf32> to vector<2x8xf32>
    %51 = vector.shape_cast %50 : vector<2x8xf32> to vector<2x8x1xf32>
    %52 = tpu.reciprocal %51 {approx = true} : vector<2x8x1xf32> -> vector<2x8x1xf32>
    %53 = vector.broadcast %52 : vector<2x8x1xf32> to vector<2x8x8xf32>
    %54 = arith.mulf %49, %53 : vector<2x8x8xf32>
    %55 = arith.truncf %54 : vector<2x8x8xf32> to vector<2x8x8xbf16>
    "tpu.trace_start"() <{level = 10 : i32, message = "bqk,bkd->bqd"}> : () -> ()
    %cst_24 = arith.constant dense<0.000000e+00> : vector<2x8x16xf32>
    %56 = tpu.matmul %55, %39, %cst_24 {dimension_numbers = #tpu.dot_dimension_numbers<[2], [1], [1], [2], [0, 0, 0, 1, 1, 2], [0], [0]>} : vector<2x8x8xbf16>, vector<2x8x16xbf16>, vector<2x8x16xf32> -> vector<2x8x16xf32>
    "tpu.trace_stop"() : () -> ()
    %57 = vector.shape_cast %56 : vector<2x8x16xf32> to vector<16x16xf32>
    %58 = arith.truncf %57 : vector<16x16xf32> to vector<16x16xbf16>
    %59 = vector.extract_strided_slice %11 {offsets = [0, 0, 0], sizes = [1, 16, 32], strides = [1, 1, 1]} : vector<2x16x32xbf16> to vector<1x16x32xbf16>
    %60 = vector.shape_cast %59 : vector<1x16x32xbf16> to vector<16x32xbf16>
    %cst_25 = arith.constant dense<0.000000e+00> : vector<16x32xf32>
    %61 = tpu.matmul %58, %60, %cst_25 {dimension_numbers = #tpu.dot_dimension_numbers<[1], [0], [0], [1], [0, 0, 1, 1], [], []>} : vector<16x16xbf16>, vector<16x32xbf16>, vector<16x32xf32> -> vector<16x32xf32>
    %62 = arith.addf %12, %61 : vector<16x32xf32>
    %63 = vector.extract_strided_slice %7 {offsets = [1, 0, 0], sizes = [1, 32, 16], strides = [1, 1, 1]} : vector<6x32x16xbf16> to vector<1x32x16xbf16>
    %64 = vector.shape_cast %63 : vector<1x32x16xbf16> to vector<32x16xbf16>
    %cst_26 = arith.constant dense<0.000000e+00> : vector<16x16xf32>
    %65 = tpu.matmul %4, %64, %cst_26 {dimension_numbers = #tpu.dot_dimension_numbers<[1], [0], [0], [1], [0, 0, 1, 1], [], []>} : vector<16x32xbf16>, vector<32x16xbf16>, vector<16x16xf32> -> vector<16x16xf32>
    %66 = vector.extract_strided_slice %9 {offsets = [1, 0, 0], sizes = [1, 1, 16], strides = [1, 1, 1]} : vector<6x1x16xf32> to vector<1x1x16xf32>
    %67 = vector.shape_cast %66 : vector<1x1x16xf32> to vector<1x16xf32>
    %68 = vector.broadcast %67 : vector<1x16xf32> to vector<16x16xf32>
    %69 = arith.addf %65, %68 : vector<16x16xf32>
    %70 = vector.extract_strided_slice %7 {offsets = [3, 0, 0], sizes = [1, 32, 16], strides = [1, 1, 1]} : vector<6x32x16xbf16> to vector<1x32x16xbf16>
    %71 = vector.shape_cast %70 : vector<1x32x16xbf16> to vector<32x16xbf16>
    %cst_27 = arith.constant dense<0.000000e+00> : vector<16x16xf32>
    %72 = tpu.matmul %4, %71, %cst_27 {dimension_numbers = #tpu.dot_dimension_numbers<[1], [0], [0], [1], [0, 0, 1, 1], [], []>} : vector<16x32xbf16>, vector<32x16xbf16>, vector<16x16xf32> -> vector<16x16xf32>
    %73 = vector.extract_strided_slice %9 {offsets = [3, 0, 0], sizes = [1, 1, 16], strides = [1, 1, 1]} : vector<6x1x16xf32> to vector<1x1x16xf32>
    %74 = vector.shape_cast %73 : vector<1x1x16xf32> to vector<1x16xf32>
    %75 = vector.broadcast %74 : vector<1x16xf32> to vector<16x16xf32>
    %76 = arith.addf %72, %75 : vector<16x16xf32>
    %77 = vector.extract_strided_slice %7 {offsets = [5, 0, 0], sizes = [1, 32, 16], strides = [1, 1, 1]} : vector<6x32x16xbf16> to vector<1x32x16xbf16>
    %78 = vector.shape_cast %77 : vector<1x32x16xbf16> to vector<32x16xbf16>
    %cst_28 = arith.constant dense<0.000000e+00> : vector<16x16xf32>
    %79 = tpu.matmul %4, %78, %cst_28 {dimension_numbers = #tpu.dot_dimension_numbers<[1], [0], [0], [1], [0, 0, 1, 1], [], []>} : vector<16x32xbf16>, vector<32x16xbf16>, vector<16x16xf32> -> vector<16x16xf32>
    %80 = vector.extract_strided_slice %9 {offsets = [5, 0, 0], sizes = [1, 1, 16], strides = [1, 1, 1]} : vector<6x1x16xf32> to vector<1x1x16xf32>
    %81 = vector.shape_cast %80 : vector<1x1x16xf32> to vector<1x16xf32>
    %82 = vector.broadcast %81 : vector<1x16xf32> to vector<16x16xf32>
    %83 = arith.addf %79, %82 : vector<16x16xf32>
    %84 = vector.shape_cast %69 : vector<16x16xf32> to vector<2x8x16xf32>
    %85 = arith.truncf %84 : vector<2x8x16xf32> to vector<2x8x16xbf16>
    %86 = vector.shape_cast %76 : vector<16x16xf32> to vector<2x8x16xf32>
    %87 = arith.truncf %86 : vector<2x8x16xf32> to vector<2x8x16xbf16>
    %88 = vector.shape_cast %83 : vector<16x16xf32> to vector<2x8x16xf32>
    %89 = arith.truncf %88 : vector<2x8x16xf32> to vector<2x8x16xbf16>
    "tpu.trace_start"() <{level = 10 : i32, message = "bqd,bkd->bqk"}> : () -> ()
    %cst_29 = arith.constant dense<0.000000e+00> : vector<2x8x8xf32>
    %90 = tpu.matmul %85, %87, %cst_29 {dimension_numbers = #tpu.dot_dimension_numbers<[2], [2], [1], [1], [0, 0, 0, 1, 1, 1], [0], [0]>} : vector<2x8x16xbf16>, vector<2x8x16xbf16>, vector<2x8x8xf32> -> vector<2x8x8xf32>
    "tpu.trace_stop"() : () -> ()
    %cst_30 = arith.constant 2.500000e-01 : f32
    %91 = vector.broadcast %cst_30 : f32 to vector<2x8x8xf32>
    %92 = arith.mulf %90, %91 : vector<2x8x8xf32>
    %93 = vector.broadcast %5 : vector<2x1x8xf32> to vector<2x8x8xf32>
    %94 = arith.addf %92, %93 : vector<2x8x8xf32>
    %cst_31 = arith.constant dense<0xFF800000> : vector<2x8xf32>
    %95 = vector.multi_reduction <maximumf>, %94, %cst_31 [2] : vector<2x8x8xf32> to vector<2x8xf32>
    %96 = vector.shape_cast %95 : vector<2x8xf32> to vector<2x8x1xf32>
    %97 = vector.broadcast %96 : vector<2x8x1xf32> to vector<2x8x8xf32>
    %98 = arith.subf %94, %97 : vector<2x8x8xf32>
    %99 = math.exp %98 : vector<2x8x8xf32>
    %cst_32 = arith.constant dense<0.000000e+00> : vector<2x8xf32>
    %100 = vector.multi_reduction <add>, %99, %cst_32 [2] : vector<2x8x8xf32> to vector<2x8xf32>
    %101 = vector.shape_cast %100 : vector<2x8xf32> to vector<2x8x1xf32>
    %102 = tpu.reciprocal %101 {approx = true} : vector<2x8x1xf32> -> vector<2x8x1xf32>
    %103 = vector.broadcast %102 : vector<2x8x1xf32> to vector<2x8x8xf32>
    %104 = arith.mulf %99, %103 : vector<2x8x8xf32>
    %105 = arith.truncf %104 : vector<2x8x8xf32> to vector<2x8x8xbf16>
    "tpu.trace_start"() <{level = 10 : i32, message = "bqk,bkd->bqd"}> : () -> ()
    %cst_33 = arith.constant dense<0.000000e+00> : vector<2x8x16xf32>
    %106 = tpu.matmul %105, %89, %cst_33 {dimension_numbers = #tpu.dot_dimension_numbers<[2], [1], [1], [2], [0, 0, 0, 1, 1, 2], [0], [0]>} : vector<2x8x8xbf16>, vector<2x8x16xbf16>, vector<2x8x16xf32> -> vector<2x8x16xf32>
    "tpu.trace_stop"() : () -> ()
    %107 = vector.shape_cast %106 : vector<2x8x16xf32> to vector<16x16xf32>
    %108 = arith.truncf %107 : vector<16x16xf32> to vector<16x16xbf16>
    %109 = vector.extract_strided_slice %11 {offsets = [1, 0, 0], sizes = [1, 16, 32], strides = [1, 1, 1]} : vector<2x16x32xbf16> to vector<1x16x32xbf16>
    %110 = vector.shape_cast %109 : vector<1x16x32xbf16> to vector<16x32xbf16>
    %cst_34 = arith.constant dense<0.000000e+00> : vector<16x32xf32>
    %111 = tpu.matmul %108, %110, %cst_34 {dimension_numbers = #tpu.dot_dimension_numbers<[1], [0], [0], [1], [0, 0, 1, 1], [], []>} : vector<16x16xbf16>, vector<16x32xbf16>, vector<16x32xf32> -> vector<16x32xf32>
    %112 = arith.addf %62, %111 : vector<16x32xf32>
    %c0_35 = arith.constant 0 : index
    %c0_36 = arith.constant 0 : index
    %c0_37 = arith.constant 0 : index
    %113 = vector.load %arg8[%c0_35, %c0_36, %c0_37] : memref<1x1x32xf32, #tpu.memory_space<vmem>>, vector<1x1x32xf32>
    %114 = vector.shape_cast %113 : vector<1x1x32xf32> to vector<1x32xf32>
    %115 = vector.broadcast %114 : vector<1x32xf32> to vector<16x32xf32>
    %116 = arith.addf %112, %115 : vector<16x32xf32>
    %117 = arith.addf %3, %116 : vector<16x32xf32>
    %c0_38 = arith.constant 0 : index
    %c0_39 = arith.constant 0 : index
    %c0_40 = arith.constant 0 : index
    %118 = vector.load %arg9[%c0_38, %c0_39, %c0_40] : memref<1x1x32xf32, #tpu.memory_space<vmem>>, vector<1x1x32xf32>
    %119 = vector.shape_cast %118 : vector<1x1x32xf32> to vector<1x32xf32>
    %c0_41 = arith.constant 0 : index
    %c0_42 = arith.constant 0 : index
    %c0_43 = arith.constant 0 : index
    %120 = vector.load %arg10[%c0_41, %c0_42, %c0_43] : memref<1x1x32xf32, #tpu.memory_space<vmem>>, vector<1x1x32xf32>
    %121 = vector.shape_cast %120 : vector<1x1x32xf32> to vector<1x32xf32>
    %cst_44 = arith.constant dense<0.000000e+00> : vector<16xf32>
    %122 = vector.multi_reduction <add>, %117, %cst_44 [1] : vector<16x32xf32> to vector<16xf32>
    %123 = vector.shape_cast %122 : vector<16xf32> to vector<16x1xf32>
    %cst_45 = arith.constant 3.200000e+01 : f32
    %124 = vector.broadcast %cst_45 : f32 to vector<16x1xf32>
    %125 = arith.divf %123, %124 : vector<16x1xf32>
    %126 = vector.broadcast %125 : vector<16x1xf32> to vector<16x32xf32>
    %127 = arith.subf %117, %126 : vector<16x32xf32>
    %128 = arith.mulf %127, %127 : vector<16x32xf32>
    %cst_46 = arith.constant dense<0.000000e+00> : vector<16xf32>
    %129 = vector.multi_reduction <add>, %128, %cst_46 [1] : vector<16x32xf32> to vector<16xf32>
    %130 = vector.shape_cast %129 : vector<16xf32> to vector<16x1xf32>
    %cst_47 = arith.constant 3.200000e+01 : f32
    %131 = vector.broadcast %cst_47 : f32 to vector<16x1xf32>
    %132 = arith.divf %130, %131 : vector<16x1xf32>
    %133 = vector.broadcast %125 : vector<16x1xf32> to vector<16x32xf32>
    %134 = arith.subf %117, %133 : vector<16x32xf32>
    %cst_48 = arith.constant 9.99999996E-13 : f32
    %135 = vector.broadcast %cst_48 : f32 to vector<16x1xf32>
    %136 = arith.addf %132, %135 : vector<16x1xf32>
    %137 = math.rsqrt %136 : vector<16x1xf32>
    %138 = vector.broadcast %137 : vector<16x1xf32> to vector<16x32xf32>
    %139 = arith.mulf %134, %138 : vector<16x32xf32>
    %140 = vector.broadcast %119 : vector<1x32xf32> to vector<16x32xf32>
    %141 = arith.mulf %139, %140 : vector<16x32xf32>
    %142 = vector.broadcast %121 : vector<1x32xf32> to vector<16x32xf32>
    %143 = arith.addf %141, %142 : vector<16x32xf32>
    %144 = arith.truncf %143 : vector<16x32xf32> to vector<16x32xbf16>
    %c0_49 = arith.constant 0 : index
    %c0_50 = arith.constant 0 : index
    %c0_51 = arith.constant 0 : index
    %145 = vector.load %arg11[%c0_49, %c0_50, %c0_51] : memref<1x32x128xbf16, #tpu.memory_space<vmem>>, vector<1x32x128xbf16>
    %146 = vector.shape_cast %145 : vector<1x32x128xbf16> to vector<32x128xbf16>
    %cst_52 = arith.constant dense<0.000000e+00> : vector<16x128xf32>
    %147 = tpu.matmul %144, %146, %cst_52 {dimension_numbers = #tpu.dot_dimension_numbers<[1], [0], [0], [1], [0, 0, 1, 1], [], []>} : vector<16x32xbf16>, vector<32x128xbf16>, vector<16x128xf32> -> vector<16x128xf32>
    %c0_53 = arith.constant 0 : index
    %c0_54 = arith.constant 0 : index
    %c0_55 = arith.constant 0 : index
    %148 = vector.load %arg12[%c0_53, %c0_54, %c0_55] : memref<1x1x128xf32, #tpu.memory_space<vmem>>, vector<1x1x128xf32>
    %149 = vector.shape_cast %148 : vector<1x1x128xf32> to vector<1x128xf32>
    %150 = vector.broadcast %149 : vector<1x128xf32> to vector<16x128xf32>
    %151 = arith.addf %147, %150 : vector<16x128xf32>
    %cst_56 = arith.constant 5.000000e-01 : f32
    %152 = vector.broadcast %cst_56 : f32 to vector<16x128xf32>
    %153 = arith.mulf %152, %151 : vector<16x128xf32>
    %cst_57 = arith.constant 4.471500e-02 : f32
    %154 = vector.broadcast %cst_57 : f32 to vector<16x128xf32>
    %155 = arith.mulf %154, %151 : vector<16x128xf32>
    %156 = arith.mulf %155, %151 : vector<16x128xf32>
    %157 = arith.mulf %156, %151 : vector<16x128xf32>
    %158 = arith.addf %151, %157 : vector<16x128xf32>
    %cst_58 = arith.constant 0.797884583 : f32
    %159 = vector.broadcast %cst_58 : f32 to vector<16x128xf32>
    %160 = arith.mulf %159, %158 : vector<16x128xf32>
    %161 = math.tanh %160 : vector<16x128xf32>
    %cst_59 = arith.constant 1.000000e+00 : f32
    %162 = vector.broadcast %cst_59 : f32 to vector<16x128xf32>
    %163 = arith.addf %162, %161 : vector<16x128xf32>
    %164 = arith.mulf %153, %163 : vector<16x128xf32>
    %165 = arith.truncf %164 : vector<16x128xf32> to vector<16x128xbf16>
    %c0_60 = arith.constant 0 : index
    %c0_61 = arith.constant 0 : index
    %c0_62 = arith.constant 0 : index
    %166 = vector.load %arg13[%c0_60, %c0_61, %c0_62] : memref<1x128x32xbf16, #tpu.memory_space<vmem>>, vector<1x128x32xbf16>
    %167 = vector.shape_cast %166 : vector<1x128x32xbf16> to vector<128x32xbf16>
    %cst_63 = arith.constant dense<0.000000e+00> : vector<16x32xf32>
    %168 = tpu.matmul %165, %167, %cst_63 {dimension_numbers = #tpu.dot_dimension_numbers<[1], [0], [0], [1], [0, 0, 1, 1], [], []>} : vector<16x128xbf16>, vector<128x32xbf16>, vector<16x32xf32> -> vector<16x32xf32>
    %c0_64 = arith.constant 0 : index
    %c0_65 = arith.constant 0 : index
    %c0_66 = arith.constant 0 : index
    %169 = vector.load %arg14[%c0_64, %c0_65, %c0_66] : memref<1x1x32xf32, #tpu.memory_space<vmem>>, vector<1x1x32xf32>
    %170 = vector.shape_cast %169 : vector<1x1x32xf32> to vector<1x32xf32>
    %171 = vector.broadcast %170 : vector<1x32xf32> to vector<16x32xf32>
    %172 = arith.addf %168, %171 : vector<16x32xf32>
    %173 = arith.addf %143, %172 : vector<16x32xf32>
    %c0_67 = arith.constant 0 : index
    %c0_68 = arith.constant 0 : index
    %c0_69 = arith.constant 0 : index
    %174 = vector.load %arg15[%c0_67, %c0_68, %c0_69] : memref<1x1x32xf32, #tpu.memory_space<vmem>>, vector<1x1x32xf32>
    %175 = vector.shape_cast %174 : vector<1x1x32xf32> to vector<1x32xf32>
    %c0_70 = arith.constant 0 : index
    %c0_71 = arith.constant 0 : index
    %c0_72 = arith.constant 0 : index
    %176 = vector.load %arg16[%c0_70, %c0_71, %c0_72] : memref<1x1x32xf32, #tpu.memory_space<vmem>>, vector<1x1x32xf32>
    %177 = vector.shape_cast %176 : vector<1x1x32xf32> to vector<1x32xf32>
    %cst_73 = arith.constant dense<0.000000e+00> : vector<16xf32>
    %178 = vector.multi_reduction <add>, %173, %cst_73 [1] : vector<16x32xf32> to vector<16xf32>
    %179 = vector.shape_cast %178 : vector<16xf32> to vector<16x1xf32>
    %cst_74 = arith.constant 3.200000e+01 : f32
    %180 = vector.broadcast %cst_74 : f32 to vector<16x1xf32>
    %181 = arith.divf %179, %180 : vector<16x1xf32>
    %182 = vector.broadcast %181 : vector<16x1xf32> to vector<16x32xf32>
    %183 = arith.subf %173, %182 : vector<16x32xf32>
    %184 = arith.mulf %183, %183 : vector<16x32xf32>
    %cst_75 = arith.constant dense<0.000000e+00> : vector<16xf32>
    %185 = vector.multi_reduction <add>, %184, %cst_75 [1] : vector<16x32xf32> to vector<16xf32>
    %186 = vector.shape_cast %185 : vector<16xf32> to vector<16x1xf32>
    %cst_76 = arith.constant 3.200000e+01 : f32
    %187 = vector.broadcast %cst_76 : f32 to vector<16x1xf32>
    %188 = arith.divf %186, %187 : vector<16x1xf32>
    %189 = vector.broadcast %181 : vector<16x1xf32> to vector<16x32xf32>
    %190 = arith.subf %173, %189 : vector<16x32xf32>
    %cst_77 = arith.constant 9.99999996E-13 : f32
    %191 = vector.broadcast %cst_77 : f32 to vector<16x1xf32>
    %192 = arith.addf %188, %191 : vector<16x1xf32>
    %193 = math.rsqrt %192 : vector<16x1xf32>
    %194 = vector.broadcast %193 : vector<16x1xf32> to vector<16x32xf32>
    %195 = arith.mulf %190, %194 : vector<16x32xf32>
    %196 = vector.broadcast %175 : vector<1x32xf32> to vector<16x32xf32>
    %197 = arith.mulf %195, %196 : vector<16x32xf32>
    %198 = vector.broadcast %177 : vector<1x32xf32> to vector<16x32xf32>
    %199 = arith.addf %197, %198 : vector<16x32xf32>
    %c0_78 = arith.constant 0 : index
    %c0_79 = arith.constant 0 : index
    %200 = vector.load %arg22[%c0_78, %c0_79] : memref<16x32xf32, #tpu.memory_space<vmem>>, vector<16x32xf32>
    tpu.vector_store %arg22[%c0_78, %c0_79], %199 {strides = array<i32>} : memref<16x32xf32, #tpu.memory_space<vmem>>, vector<16x32xf32>,
    %c1_i32 = arith.constant 1 : i32
    %201 = arith.cmpi eq, %arg0, %c1_i32 : i32
    %202 = arith.extui %201 : i1 to i32
    %c0_i32_80 = arith.constant 0 : i32
    %203 = arith.cmpi ne, %202, %c0_i32_80 : i32
    scf.if %203 {
      %204 = vector.shape_cast %199 : vector<16x32xf32> to vector<2x8x32xf32>
      %205 = vector.extract_strided_slice %204 {offsets = [0, 0, 0], sizes = [2, 1, 32], strides = [1, 1, 1]} : vector<2x8x32xf32> to vector<2x1x32xf32>
      %206 = vector.shape_cast %205 : vector<2x1x32xf32> to vector<2x32xf32>
      %207 = arith.truncf %206 : vector<2x32xf32> to vector<2x32xbf16>
      %c0_81 = arith.constant 0 : index
      %c0_82 = arith.constant 0 : index
      %208 = vector.load %arg17[%c0_81, %c0_82] : memref<32x32xbf16, #tpu.memory_space<vmem>>, vector<32x32xbf16>
      %cst_83 = arith.constant dense<0.000000e+00> : vector<2x32xf32>
      %209 = tpu.matmul %207, %208, %cst_83 {dimension_numbers = #tpu.dot_dimension_numbers<[1], [0], [0], [1], [0, 0, 1, 1], [], []>} : vector<2x32xbf16>, vector<32x32xbf16>, vector<2x32xf32> -> vector<2x32xf32>
      %c0_84 = arith.constant 0 : index
      %c0_85 = arith.constant 0 : index
      %210 = vector.load %arg18[%c0_84, %c0_85] : memref<1x32xf32, #tpu.memory_space<vmem>>, vector<1x32xf32>
      %211 = vector.broadcast %210 : vector<1x32xf32> to vector<2x32xf32>
      %212 = arith.addf %209, %211 : vector<2x32xf32>
      %213 = math.tanh %212 : vector<2x32xf32>
      %214 = arith.truncf %213 : vector<2x32xf32> to vector<2x32xbf16>
      %c0_86 = arith.constant 0 : index
      %c0_87 = arith.constant 0 : index
      %215 = vector.load %arg19[%c0_86, %c0_87] : memref<32x128xbf16, #tpu.memory_space<vmem>>, vector<32x128xbf16>
      %cst_88 = arith.constant dense<0.000000e+00> : vector<2x128xf32>
      %216 = tpu.matmul %214, %215, %cst_88 {dimension_numbers = #tpu.dot_dimension_numbers<[1], [0], [0], [1], [0, 0, 1, 1], [], []>} : vector<2x32xbf16>, vector<32x128xbf16>, vector<2x128xf32> -> vector<2x128xf32>
      %c0_89 = arith.constant 0 : index
      %c0_90 = arith.constant 0 : index
      %217 = vector.load %arg20[%c0_89, %c0_90] : memref<1x128xf32, #tpu.memory_space<vmem>>, vector<1x128xf32>
      %218 = vector.broadcast %217 : vector<1x128xf32> to vector<2x128xf32>
      %219 = arith.addf %216, %218 : vector<2x128xf32>
      %c0_91 = arith.constant 0 : index
      %c0_92 = arith.constant 0 : index
      %220 = vector.load %arg21[%c0_91, %c0_92] : memref<2x128xf32, #tpu.memory_space<vmem>>, vector<2x128xf32>
      tpu.vector_store %arg21[%c0_91, %c0_92], %219 {strides = array<i32>} : memref<2x128xf32, #tpu.memory_space<vmem>>, vector<2x128xf32>,
    } else {
    }
    return
  }
  func.func @transform_0(%arg0: i32) -> (i32, i32, i32) {
    %c0_i32 = arith.constant 0 : i32
    %c0_i32_0 = arith.constant 0 : i32
    %c0_i32_1 = arith.constant 0 : i32
    %c0_i32_2 = arith.constant 0 : i32
    return %c0_i32, %c0_i32_0, %c0_i32_1 : i32, i32, i32
  }
  func.func @transform_1(%arg0: i32) -> (i32, i32, i32) {
    %c0_i32 = arith.constant 0 : i32
    %c0_i32_0 = arith.constant 0 : i32
    %c0_i32_1 = arith.constant 0 : i32
    %c0_i32_2 = arith.constant 0 : i32
    return %c0_i32, %c0_i32_0, %c0_i32_1 : i32, i32, i32
  }
  func.func @transform_2(%arg0: i32) -> (i32, i32) {
    %c0_i32 = arith.constant 0 : i32
    %c0_i32_0 = arith.constant 0 : i32
    %c0_i32_1 = arith.constant 0 : i32
    return %c0_i32, %c0_i32_0 : i32, i32
  }
  func.func @transform_3(%arg0: i32) -> (i32, i32) {
    %c0_i32 = arith.constant 0 : i32
    %c0_i32_0 = arith.constant 0 : i32
    %c0_i32_1 = arith.constant 0 : i32
    return %c0_i32, %c0_i32_0 : i32, i32
  }
  func.func @transform_4(%arg0: i32) -> (i32, i32, i32, i32) {
    %c0_i32 = arith.constant 0 : i32
    %c0_i32_0 = arith.constant 0 : i32
    %c0_i32_1 = arith.constant 0 : i32
    %c0_i32_2 = arith.constant 0 : i32
    return %arg0, %c0_i32, %c0_i32_0, %c0_i32_1 : i32, i32, i32, i32
  }
  func.func @transform_5(%arg0: i32) -> (i32, i32, i32, i32) {
    %c0_i32 = arith.constant 0 : i32
    %c0_i32_0 = arith.constant 0 : i32
    %c0_i32_1 = arith.constant 0 : i32
    %c0_i32_2 = arith.constant 0 : i32
    return %arg0, %c0_i32, %c0_i32_0, %c0_i32_1 : i32, i32, i32, i32
  }
  func.func @transform_6(%arg0: i32) -> (i32, i32, i32, i32) {
    %c0_i32 = arith.constant 0 : i32
    %c0_i32_0 = arith.constant 0 : i32
    %c0_i32_1 = arith.constant 0 : i32
    %c0_i32_2 = arith.constant 0 : i32
    return %arg0, %c0_i32, %c0_i32_0, %c0_i32_1 : i32, i32, i32, i32
  }
  func.func @transform_7(%arg0: i32) -> (i32, i32, i32) {
    %c0_i32 = arith.constant 0 : i32
    %c0_i32_0 = arith.constant 0 : i32
    %c0_i32_1 = arith.constant 0 : i32
    return %arg0, %c0_i32, %c0_i32_0 : i32, i32, i32
  }
  func.func @transform_8(%arg0: i32) -> (i32, i32, i32) {
    %c0_i32 = arith.constant 0 : i32
    %c0_i32_0 = arith.constant 0 : i32
    %c0_i32_1 = arith.constant 0 : i32
    return %arg0, %c0_i32, %c0_i32_0 : i32, i32, i32
  }
  func.func @transform_9(%arg0: i32) -> (i32, i32, i32) {
    %c0_i32 = arith.constant 0 : i32
    %c0_i32_0 = arith.constant 0 : i32
    %c0_i32_1 = arith.constant 0 : i32
    return %arg0, %c0_i32, %c0_i32_0 : i32, i32, i32
  }
  func.func @transform_10(%arg0: i32) -> (i32, i32, i32) {
    %c0_i32 = arith.constant 0 : i32
    %c0_i32_0 = arith.constant 0 : i32
    %c0_i32_1 = arith.constant 0 : i32
    return %arg0, %c0_i32, %c0_i32_0 : i32, i32, i32
  }
  func.func @transform_11(%arg0: i32) -> (i32, i32, i32) {
    %c0_i32 = arith.constant 0 : i32
    %c0_i32_0 = arith.constant 0 : i32
    %c0_i32_1 = arith.constant 0 : i32
    return %arg0, %c0_i32, %c0_i32_0 : i32, i32, i32
  }
  func.func @transform_12(%arg0: i32) -> (i32, i32, i32) {
    %c0_i32 = arith.constant 0 : i32
    %c0_i32_0 = arith.constant 0 : i32
    %c0_i32_1 = arith.constant 0 : i32
    return %arg0, %c0_i32, %c0_i32_0 : i32, i32, i32
  }
  func.func @transform_13(%arg0: i32) -> (i32, i32, i32) {
    %c0_i32 = arith.constant 0 : i32
    %c0_i32_0 = arith.constant 0 : i32
    %c0_i32_1 = arith.constant 0 : i32
    return %arg0, %c0_i32, %c0_i32_0 : i32, i32, i32
  }
  func.func @transform_14(%arg0: i32) -> (i32, i32, i32) {
    %c0_i32 = arith.constant 0 : i32
    %c0_i32_0 = arith.constant 0 : i32
    %c0_i32_1 = arith.constant 0 : i32
    return %arg0, %c0_i32, %c0_i32_0 : i32, i32, i32
  }
  func.func @transform_15(%arg0: i32) -> (i32, i32, i32) {
    %c0_i32 = arith.constant 0 : i32
    %c0_i32_0 = arith.constant 0 : i32
    %c0_i32_1 = arith.constant 0 : i32
    return %arg0, %c0_i32, %c0_i32_0 : i32, i32, i32
  }
  func.func @transform_16(%arg0: i32) -> (i32, i32) {
    %c0_i32 = arith.constant 0 : i32
    %c0_i32_0 = arith.constant 0 : i32
    %c0_i32_1 = arith.constant 0 : i32
    return %c0_i32, %c0_i32_0 : i32, i32
  }
  func.func @transform_17(%arg0: i32) -> (i32, i32) {
    %c0_i32 = arith.constant 0 : i32
    %c0_i32_0 = arith.constant 0 : i32
    %c0_i32_1 = arith.constant 0 : i32
    return %c0_i32, %c0_i32_0 : i32, i32
  }
  func.func @transform_18(%arg0: i32) -> (i32, i32) {
    %c0_i32 = arith.constant 0 : i32
    %c0_i32_0 = arith.constant 0 : i32
    %c0_i32_1 = arith.constant 0 : i32
    return %c0_i32, %c0_i32_0 : i32, i32
  }
  func.func @transform_19(%arg0: i32) -> (i32, i32) {
    %c0_i32 = arith.constant 0 : i32
    %c0_i32_0 = arith.constant 0 : i32
    %c0_i32_1 = arith.constant 0 : i32
    return %c0_i32, %c0_i32_0 : i32, i32
  }
  func.func @transform_20(%arg0: i32) -> (i32, i32) {
    %c0_i32 = arith.constant 0 : i32
    %c0_i32_0 = arith.constant 0 : i32
    %c0_i32_1 = arith.constant 0 : i32
    return %c0_i32, %c0_i32_0 : i32, i32
  }
}

</mosaic_0001>

<bundles_post_ra>
// kernel: sentiment_classifier_forward.1
= control target key start
LH: loop header
LB: loop body
LE: loop exit
PB: predicated region body
PF: predicated region fallthrough
CT: control target
= control target key end

     0   :  { %s3290_s0 = inlined_call_operand.vmem [shape: f32[2,8,32], index: 0, kind: input, shape index: {}]   ;;  %s3291_s1 = inlined_call_operand.vmem [shape: f32[2,1,8], index: 1, kind: input, shape index: {}]   ;;  %s3292_s2 = inlined_call_operand.vmem [shape: f32[1,32], index: 2, kind: input, shape index: {}]   ;;  %s3293_s3 = inlined_call_operand.vmem [shape: f32[1,32], index: 3, kind: input, shape index: {}]   ;;  %s3294_s4 = inlined_call_operand.vmem [shape: bf16[2,6,32,16], index: 4, kind: input, shape index: {}]   ;;  %s3295_s5 = inlined_call_operand.vmem [shape: f32[2,6,1,16], index: 5, kind: input, shape index: {}]   ;;  %s3296_s6 = inlined_call_operand.vmem [shape: bf16[2,2,16,32], index: 6, kind: input, shape index: {}]   ;;  %s3297_s7 = inlined_call_operand.vmem [shape: f32[2,1,32], index: 7, kind: input, shape index: {}]   ;;  %s3298_s8 = inlined_call_operand.vmem [shape: f32[2,1,32], index: 8, kind: input, shape index: {}]   ;;  %s3299_s9 = inlined_call_operand.vmem [shape: f32[2,1,32], index: 9, kind: input, shape index: {}]   ;;  %s3300_s10 = inlined_call_operand.vmem [shape: bf16[2,32,128], index: 10, kind: input, shape index: {}]   ;;  %s3301_s11 = inlined_call_operand.vmem [shape: f32[2,1,128], index: 11, kind: input, shape index: {}]   ;;  %s3302_s12 = inlined_call_operand.vmem [shape: bf16[2,128,32], index: 12, kind: input, shape index: {}]   ;;  %s3303_s13 = inlined_call_operand.vmem [shape: f32[2,1,32], index: 13, kind: input, shape index: {}]   ;;  %s3304_s14 = inlined_call_operand.vmem [shape: f32[2,1,32], index: 14, kind: input, shape index: {}]   ;;  %s3305_s15 = inlined_call_operand.vmem [shape: f32[2,1,32], index: 15, kind: input, shape index: {}]   ;;  %s3306_s16 = inlined_call_operand.vmem [shape: bf16[32,32], index: 16, kind: input, shape index: {}]   ;;  %s3307_s17 = inlined_call_operand.vmem [shape: f32[1,32], index: 17, kind: input, shape index: {}]   ;;  %s3308_s18 = inlined_call_operand.vmem [shape: bf16[32,128], index: 18, kind: input, shape index: {}]   ;;  %s3309_s19 = inlined_call_operand.vmem [shape: f32[1,128], index: 19, kind: input, shape index: {}]   ;;  %s3310_s20 = inlined_call_operand.hbm [shape: f32[2,128], index: 20, kind: output, shape index: {}]  }
   0x1   :  { %3318 = sst [smem:[#allocation8_spill]] %s3290_s0 }
   0x2   :  { %3319 = sst [smem:[#allocation9_spill]] %s3291_s1 }
   0x3   :  { %3320 = sst [smem:[#allocation10_spill]] %s3292_s2 }
   0x4   :  { %3321 = sst [smem:[#allocation11_spill]] %s3293_s3 }
   0x5   :  { %3322 = sst [smem:[#allocation12_spill]] %s3294_s4 }
   0x6   :  { %3323 = sst [smem:[#allocation13_spill]] %s3296_s6 }
   0x7   :  { %3324 = sst [smem:[#allocation14_spill]] %s3306_s16 }
   0x8   :  { %3325 = sst [smem:[#allocation15_spill]] %s3307_s17 }
   0x9   :  { %3326 = sst [smem:[#allocation16_spill]] %s3308_s18 }
   0xa   :  { %3327 = sst [smem:[#allocation17_spill]] %s3309_s19 }
   0xb   :  { %3328 = sst [smem:[#allocation18_spill]] %s3310_s20 }
   0xc   :  { %25 = vsyncpa [#allocation4], 0  ;;  %s2930_s1 = smov 0  }
   0xd LB: > { %3329 = sst [smem:[#allocation6_spill]] %s2818_s1  ;;  %s2936_s22 = sadd.s32 4294967295, %s2818_s1   ;;  %s2818_s1 = sphi %s2930_s1, %s31_s1  }
   0xe   : > { %p2408_p0 = scmp.ge.s32.totalorder %s2818_s1, 1  ;;  %p653_p1 = scmp.lt.s32.totalorder %s2818_s1, 3 }
  0x10   : > { %p654_p2 = pnand %p2408_p0, %p653_p1 }
  0x12   : > { %657 = sbr.rel (%p654_p2) target bundleno = 3899 (0xf3b), region = 100 }
  0x19   : > { %p746_p3 = scmp.lt.s32.totalorder %s2936_s22, 1  ;;  %s3330_s6 = sld [smem:[#allocation13_spill]] }
  0x1a   : > { %s3332_s29 = sld [smem:[#allocation12_spill]]  ;;  %p2416_p4 = scmp.ne.s32.totalorder %s2936_s22, 0 }
  0x1b   : > { %s2942_s23 = scalar_select %p746_p3, %s2936_s22, 1 }
  0x1c   : > { %s3333_s20 = sld [smem:[#allocation8_spill]] (!%p2416_p4)  ;;  %vm800_vm0 = vcmask (!%p2416_p4), 261120   ;;  %s3334_s18 = sld [smem:[#allocation10_spill]] (!%p2416_p4) }
  0x1d   : > { %s2699_s24 = smul.u32 96, %s2942_s23  ;;  %s2488_s2 = sshll.u32 %s2942_s23, 4 }
  0x1e   : > { %s2700_s25 = smul.u32 6, %s2942_s23  ;;  %s2977_s4 = scalar_lea.vmem %s3300_s10, %s2488_s2 }
  0x1f   : > { %s2950_s27 = scalar_lea.vmem %s3330_s6, %s2488_s2  ;;  %s776_s21 = scalar_lea.vmem %s3301_s11, %s2942_s23 }
  0x20   : > { %3331 = sst [smem:[#allocation7_spill]] %s2950_s27  ;;  %s2955_s30 = scalar_lea.vmem %s3332_s29, %s2699_s24 }
  0x21   : > { %s2964_s17 = scalar_lea.vmem %s3295_s5, %s2700_s25  ;;  %s2490_s19 = sshll.u32 %s2942_s23, 6 }
  0x22   : > { %s2987_s1 = scalar_lea.vmem %s3302_s12, %s2490_s19  ;;  %s784_s6 = scalar_lea.vmem %s3303_s13, %s2942_s23  ;;  %v796_v0 = vld [vmem:[%s3333_s20] sm:$0xff] (!%p2416_p4)  ;;  %v797_v1 = vld [vmem:[%s3333_s20 + $0x8] sm:$0xff] (!%p2416_p4) }
  0x23   : > { %s787_s28 = scalar_lea.vmem %s3304_s14, %s2942_s23  ;;  %s790_s3 = scalar_lea.vmem %s3305_s15, %s2942_s23  ;;  %v801_v2 = vsel (!%p2416_p4), %vm800_vm0, %v796_v0, 0.0  ;;  %v804_v3 = vsel (!%p2416_p4), %vm800_vm0, %v797_v1, 0.0  ;;  %v2417_v21 = vld [vmem:[%s3334_s18] ss:$0 sm:$0xff] (!%p2416_p4) }
  0x24   : > { %795 = sbr.rel (%p2416_p4) target bundleno = 353 (0x161), region = 104  ;;  %802 = vadd.xlane.f32.xlu0 (!%p2416_p4), %v801_v2  ;;  %s3335_s24 = sld [smem:[#allocation11_spill]] (!%p2416_p4) }
  0x28   : > { %805 = vadd.xlane.f32.xlu0 (!%p2416_p4), %v804_v3 }
  0x2a   : > { %v2418_v23 = vld [vmem:[%s3335_s24] ss:$0 sm:$0xff] (!%p2416_p4) }
  0xb1   : > { %v803_v4 = vpop.xlane.xlu0 %802 }
  0xb2   : > { %v808_v5 = vmul.f32 0.03125, %v803_v4 }
  0xb4   : > { %v810_v6 = vsub.f32 %v796_v0, %v808_v5 }
  0xb5   : > { %v806_v7 = vpop.xlane.xlu0 %805 }
  0xb6   : > { %v809_v8 = vmul.f32 0.03125, %v806_v7  ;;  %v812_v9 = vmul.f32 %v810_v6, %v810_v6 }
  0xb8   : > { %v811_v10 = vsub.f32 %v797_v1, %v809_v8  ;;  %v814_v11 = vsel %vm800_vm0, %v812_v9, 0.0 }
  0xb9   : > { %815 = vadd.xlane.f32.xlu1 %v814_v11 }
  0xba   : > { %v813_v12 = vmul.f32 %v811_v10, %v811_v10 }
  0xbc   : > { %v817_v13 = vsel %vm800_vm0, %v813_v12, 0.0 }
  0xbd   : > { %818 = vadd.xlane.f32.xlu1 %v817_v13 }
 0x146   : > { %v816_v14 = vpop.xlane.xlu1 %815 }
 0x147   : > { %v820_v15 = vmul.f32 0.03125, %v816_v14 }
 0x149   : > { %v822_v16 = vadd.f32 1e-12, %v820_v15 }
 0x14a   : > { %v819_v17 = vpop.xlane.xlu1 %818 }
 0x14b   : > { %2720 = vrsqrt.f32 %v822_v16  ;;  %v821_v18 = vmul.f32 0.03125, %v819_v17 }
 0x14d   : > { %v823_v19 = vadd.f32 1e-12, %v821_v18 }
 0x14f   : > { %2722 = vrsqrt.f32 %v823_v19 }
 0x155   : > { %v2721_v20 = vpop.eup %2720 }
 0x156   : > { %v826_v22 = vmul.f32 %v2721_v20, %v810_v6 }
 0x158   : > { %v834_v24 = vmul.f32 %v2417_v21, %v826_v22 }
 0x159   : > { %v2723_v25 = vpop.eup %2722 }
 0x15a   : > { %v842_v26 = vadd.f32 %v2418_v23, %v834_v24  ;;  %v827_v27 = vmul.f32 %v2723_v25, %v811_v10 }
 0x15c   : > { %844 = vst.msk [vmem:[#allocation2] sm:$0xff] %vm800_vm0, %v842_v26  ;;  %v835_v28 = vmul.f32 %v2417_v21, %v827_v27 }
 0x15e   : > { %v843_v29 = vadd.f32 %v2418_v23, %v835_v28 }
 0x160   : > { %845 = vst.msk [vmem:[#allocation2 + $0x8] sm:$0xff] %vm800_vm0, %v843_v29 }
 0x161 PF: > { %v2724_v30 = vld [vmem:[%s2955_s30] sm:$0xff]   ;;  %v2820_v31 = vmov 0.0   ;;  %v2725_v32 = vld [vmem:[%s2955_s30 + $0x8] sm:$0xff]   ;;  %vm2821_vm1 = vmmov 0   ;;  %vm903_vm2 = vcmask 261120   ;;  %vm1072_vm3 = vcmask 130048   ;;  %s3338_s18 = scalar_lea.vmem %s3297_s7, %s2942_s23  ;;  %s3339_s24 = scalar_lea.vmem %s3298_s8, %s2942_s23 }
 0x162   : > { %2547 = vmatprep.subr.bf16.mxu0 %v2820_v31  ;;  %2571 = vmatprep.subr.bf16.mxu1 %v2820_v31  ;;  %v2726_v35 = vld [vmem:[%s2955_s30 + $0x20] sm:$0xff]   ;;  %v2727_v37 = vld [vmem:[%s2955_s30 + $0x28] sm:$0xff]   ;;  %vm1209_vm4 = vcmask 1043456   ;;  %s3336_s19 = sld [smem:[#allocation9_spill]]  ;;  %vm1181_vm5 = vcmask 64512   ;;  %s3340_s0 = scalar_lea.vmem %s3299_s9, %s2942_s23 }
 0x163   : > { %2548 = vmatpush3.bf16.msra.mxu0 %v2724_v30  ;;  %2551 = vmatprep.mubr.msk.bf16.mxu0 %vm2821_vm1, %v2820_v31  ;;  %v3026_v33 = vld [vmem:[#allocation2] sm:$0xff]  ;;  %v2729_v39 = vld [vmem:[%s2955_s30 + $0x48] sm:$0xff]   ;;  %p2475_p5 = scmp.ne.s32.totalorder %s2936_s22, 1 }
 0x164   : > { %2549 = vmatprep.subr.bf16.mxu0 %v2820_v31  ;;  %2573 = vmatprep.mubr.msk.bf16.mxu1 %vm2821_vm1, %v2820_v31  ;;  %v2728_v38 = vld [vmem:[%s2955_s30 + $0x40] sm:$0xff]   ;;  %s3341_s26 = sld [smem:[#allocation14_spill]] (!%p2475_p5)  ;;  %vm2823_vm6 = vmmov (!%p2475_p5), 0   ;;  %vm2121_vm7 = vcmask (!%p2475_p5), 1041409  }
 0x165   : > { %v2423_v44 = vld [vmem:[%s2964_s17 + $0x2] ss:$0 sm:$0xff]  ;;  %v2419_v52 = vld [vmem:[%s2964_s17] ss:$0 sm:$0xff]  ;;  %v2427_v60 = vld [vmem:[%s2964_s17 + $0x4] ss:$0 sm:$0xff] }
 0x167   : > { %v3028_v34 = vld [vmem:[#allocation2 + $0x8] sm:$0xff]  ;;  %2550 = vmatpush3.bf16.msra.mxu0 %v2725_v32 }
 0x168   : > { %v3036_v36 = vpack.c.bf16 %v3028_v34, %v3026_v33  ;;  %2555 = vmatprep.subr.bf16.mxu0 %v2820_v31  ;;  %v3078_v11 = vld [vmem:[%s3336_s19 + $0x1] ss:$0 sm:$0xff]  ;;  %v3083_v17 = vld [vmem:[%s3336_s19] ss:$0 sm:$0xff] }
 0x16a   : > { %2552 = vmatmul.mubr.msk.bf16.vlgmr.msra.gmra.mrb[0].mxu0 %vm903_vm2, %v3036_v36 }
 0x16b   : > { %2556 = vmatpush3.bf16.msra.mxu0 %v2726_v35  ;;  %2559 = vmatprep.mubr.msk.bf16.mxu0 %vm2821_vm1, %v2820_v31 }
 0x16c   : > { %2557 = vmatprep.subr.bf16.mxu0 %v2820_v31 }
 0x16f   : > { %2558 = vmatpush3.bf16.msra.mxu0 %v2727_v37 }
 0x170   : > { %2563 = vmatprep.subr.bf16.mxu0 %v2820_v31 }
 0x172   : > { %2560 = vmatmul.mubr.msk.bf16.vlgmr.msra.gmra.mrb[4].mxu0 %vm903_vm2, %v3036_v36 }
 0x173   : > { %2567 = vmatprep.mubr.msk.bf16.mxu0 %vm2821_vm1, %v2820_v31  ;;  %2564 = vmatpush3.bf16.msra.mxu0 %v2728_v38 }
 0x174   : > { %2565 = vmatprep.subr.bf16.mxu0 %v2820_v31 }
 0x177   : > { %2566 = vmatpush3.bf16.msra.mxu0 %v2729_v39 }
 0x178   : > { %2577 = vmatprep.subr.bf16.mxu0 %v2820_v31 }
 0x17a   : > { %2568 = vmatmul.mubr.msk.bf16.vlgmr.msra.gmra.mrb[8].mxu0 %vm903_vm2, %v3036_v36 }
 0x17b   : > { %2579 = vmatprep.mubr.msk.bf16.mxu0 %vm2821_vm1, %v2820_v31 }
 0x23d   : > { %v941_v40 = vpop.f32.mrb[0].mxu0 }
 0x23e   : > { %v2553_v41 = vpop.f32.mrb[1].mxu0  ;;  %v942_v55 = vadd.f32 %v2419_v52, %v941_v40 }
 0x23f   : > { %v944_v42 = vpop.f32.mrb[2].mxu0  ;;  %v2730_v41 = vld [vmem:[%s2955_s30 + $0x30] sm:$0xff]  }
 0x240   : > { %v2554_v43 = vpop.f32.mrb[3].mxu0  ;;  %v945_v57 = vadd.f32 %v2419_v52, %v944_v42  ;;  %v1066_v58 = vpack.c.bf16 %v942_v55, %v942_v55 }
 0x242   : > { %v1067_v59 = vpack.c.bf16 %v945_v57, %v945_v57 }
 0x245   : > { %v1000_v45 = vpop.f32.mrb[4].mxu0 }
 0x246   : > { %v1001_v46 = vadd.f32 %v2423_v44, %v1000_v45  ;;  %v2561_v47 = vpop.f32.mrb[5].mxu0  ;;  %v2731_v45 = vld [vmem:[%s2955_s30 + $0x38] sm:$0xff]  }
 0x247   : > { %v1003_v48 = vpop.f32.mrb[6].mxu0 }
 0x248   : > { %v1068_v49 = vpack.c.bf16 %v1001_v46, %v1001_v46  ;;  %v1004_v50 = vadd.f32 %v2423_v44, %v1003_v48  ;;  %v2562_v51 = vpop.f32.mrb[7].mxu0  ;;  %v2732_v46 = vld [vmem:[%s2955_s30 + $0x10] sm:$0xff]   ;;  %v2733_v48 = vld [vmem:[%s2955_s30 + $0x18] sm:$0xff]  }
 0x24a   : > { %v1069_v53 = vpack.c.bf16 %v1004_v50, %v1004_v50  ;;  %v1077_v54 = vsel %vm1072_vm3, %v1068_v49, 0  ;;  %v2734_v49 = vld [vmem:[%s2955_s30 + $0x50] sm:$0xff]   ;;  %v2735_v50 = vld [vmem:[%s2955_s30 + $0x58] sm:$0xff]  }
 0x24b   : > { %2572 = vmatpush3.bf16.xpose.msra.mxu1 %v1077_v54 }
 0x24c   : > { %v1123_v56 = vsel %vm1072_vm3, %v1069_v53, 0  ;;  %2583 = vmatprep.subr.bf16.mxu1 %v2820_v31 }
 0x24d   : > { %2578 = vmatpush3.bf16.xpose.msra.mxu0 %v1123_v56  ;;  %v1059_v61 = vpop.f32.mrb[8].mxu0 }
 0x24e   : > { %2589 = vmatprep.subr.bf16.mxu0 %v2820_v31  ;;  %v1060_v62 = vadd.f32 %v2427_v60, %v1059_v61  ;;  %v2569_v63 = vpop.f32.mrb[9].mxu0 }
 0x24f   : > { %v1062_v0 = vpop.f32.mrb[10].mxu0 }
 0x250   : > { %v1070_v1 = vpack.c.bf16 %v1060_v62, %v1060_v62  ;;  %v1063_v2 = vadd.f32 %v2427_v60, %v1062_v0  ;;  %v2570_v3 = vpop.f32.mrb[11].mxu0  ;;  %v2437_v0 = vld [vmem:[%s2964_s17 + $0x1] ss:$0 sm:$0xff] }
 0x252   : > { %2574 = vmatmul.mubr.msk.bf16.vlgmr.msra.gmra.mrb[0].mxu1 %vm1072_vm3, %v1066_v58  ;;  %v1211_v4 = vsel %vm1209_vm4, %v1070_v1, 0  ;;  %v1071_v5 = vpack.c.bf16 %v1063_v2, %v1063_v2 }
 0x253   : > { %2585 = vmatprep.mubr.msk.bf16.mxu1 %vm2821_vm1, %v2820_v31  ;;  %2584 = vmatpush3.bf16.msra.mxu1 %v1211_v4 }
 0x254   : > { %2580 = vmatmul.mubr.msk.bf16.vlgmr.msra.gmra.mrb[12].mxu0 %vm1072_vm3, %v1067_v59  ;;  %v1257_v6 = vsel %vm1209_vm4, %v1071_v5, 0  ;;  %2595 = vmatprep.subr.bf16.mxu1 %v2820_v31  ;;  %v2441_v59 = vld [vmem:[%s2964_s17 + $0x3] ss:$0 sm:$0xff] }
 0x255   : > { %2591 = vmatprep.mubr.msk.bf16.mxu0 %vm2821_vm1, %v2820_v31  ;;  %2590 = vmatpush3.bf16.msra.mxu0 %v1257_v6 }
 0x256   : > { %2603 = vmatprep.subr.bf16.mxu0 %v2820_v31 }
 0x325   : > { %v1113_v7 = vpop.f32.mrb[0].mxu1 }
 0x326   : > { %v2575_v8 = vpop.f32.mrb[1].mxu1  ;;  %v1165_v12 = vmul.f32 0.25, %v1113_v7 }
 0x327   : > { %v1116_v9 = vpop.f32.mrb[2].mxu1  ;;  %v1159_v10 = vpop.f32.mrb[12].mxu0 }
 0x328   : > { %v1166_v13 = vmul.f32 0.25, %v1159_v10  ;;  %v2576_v14 = vpop.f32.mrb[3].mxu1  ;;  %v2581_v15 = vpop.f32.mrb[13].mxu0  ;;  %v1179_v21 = vadd.f32 %v3083_v17, %v1165_v12 }
 0x329   : > { %v1162_v16 = vpop.f32.mrb[14].mxu0 }
 0x32a   : > { %v2582_v18 = vpop.f32.mrb[15].mxu0  ;;  %v1180_v19 = vadd.f32 %v3078_v11, %v1166_v13  ;;  %v1182_v22 = vsel %vm1181_vm5, %v1179_v21, -inf  ;;  %v2445_v16 = vld [vmem:[%s2964_s17 + $0x5] ss:$0 sm:$0xff]  ;;  %s3337_s17 = sld [smem:[#allocation7_spill]] }
 0x32c   : > { %v1185_v20 = vsel %vm1181_vm5, %v1180_v19, -inf }
 0x32d   : > { %1186 = vmax.xlane.f32.xlu0 %v1185_v20 }
 0x331   : > { %1183 = vmax.xlane.f32.xlu0 %v1182_v22 }
 0x3ba   : > { %v1187_v23 = vpop.xlane.xlu0 %1186 }
 0x3bb   : > { %v1189_v24 = vsub.f32 %v1180_v19, %v1187_v23 }
 0x3bd   : > { %v1192_v25 = vmul.f32 1.442695, %v1189_v24 }
 0x3be   : > { %v1184_v26 = vpop.xlane.xlu0 %1183 }
 0x3bf   : > { %2748 = vpow2.f32 %v1192_v25  ;;  %v1188_v27 = vsub.f32 %v1179_v21, %v1184_v26 }
 0x3c1   : > { %v1190_v28 = vmul.f32 1.442695, %v1188_v27 }
 0x3c3   : > { %2750 = vpow2.f32 %v1190_v28 }
 0x3c9   : > { %v2749_v29 = vpop.eup %2748 }
 0x3ca   : > { %v1197_v30 = vsel %vm1181_vm5, %v2749_v29, 0.0 }
 0x3cb   : > { %1198 = vadd.xlane.f32.xlu1 %v1197_v30 }
 0x3cd   : > { %v2751_v32 = vpop.eup %2750 }
 0x3ce   : > { %v1194_v35 = vsel %vm1181_vm5, %v2751_v32, 0.0 }
 0x3cf   : > { %1195 = vadd.xlane.f32.xlu1 %v1194_v35 }
 0x458   : > { %v1199_v37 = vpop.xlane.xlu1 %1198 }
 0x459   : > { %2752 = vrcp.f32 %v1199_v37 }
 0x45c   : > { %v1196_v38 = vpop.xlane.xlu1 %1195 }
 0x45d   : > { %2754 = vrcp.f32 %v1196_v38 }
 0x463   : > { %v2753_v39 = vpop.eup %2752 }
 0x464   : > { %v1203_v40 = vmul.f32 %v2753_v39, %v2749_v29 }
 0x466   : > { %v1205_v42 = vpack.c.bf16 %v1203_v40, %v1203_v40 }
 0x467   : > { %v2755_v43 = vpop.eup %2754 }
 0x468   : > { %v1202_v44 = vmul.f32 %v2755_v43, %v2751_v32  ;;  %2592 = vmatmul.mubr.msk.bf16.vlgmr.msra.gmra.mrb[16].mxu0 %vm1181_vm5, %v1205_v42 }
 0x469   : > { %2604 = vmatpush3.bf16.msra.mxu0 %v2730_v41  ;;  %2607 = vmatprep.mubr.msk.bf16.mxu0 %vm2821_vm1, %v2820_v31 }
 0x46a   : > { %v1204_v47 = vpack.c.bf16 %v1202_v44, %v1202_v44  ;;  %2605 = vmatprep.subr.bf16.mxu0 %v2820_v31 }
 0x46c   : > { %2586 = vmatmul.mubr.msk.bf16.vlgmr.msra.gmra.mrb[4].mxu1 %vm1181_vm5, %v1204_v47 }
 0x46d   : > { %2606 = vmatpush3.bf16.msra.mxu0 %v2731_v45  ;;  %2596 = vmatpush3.bf16.msra.mxu1 %v2732_v46 }
 0x46e   : > { %2597 = vmatprep.subr.bf16.mxu1 %v2820_v31  ;;  %2599 = vmatprep.mubr.msk.bf16.mxu1 %vm2821_vm1, %v2820_v31 }
 0x46f   : > { %2619 = vmatprep.subr.bf16.mxu0 %v2820_v31 }
 0x470   : > { %2608 = vmatmul.mubr.msk.bf16.vlgmr.msra.gmra.mrb[20].mxu0 %vm903_vm2, %v3036_v36 }
 0x471   : > { %2598 = vmatpush3.bf16.msra.mxu1 %v2733_v48  ;;  %2621 = vmatprep.mubr.msk.bf16.mxu0 %vm2821_vm1, %v2820_v31 }
 0x472   : > { %2611 = vmatprep.subr.bf16.mxu1 %v2820_v31 }
 0x474   : > { %2600 = vmatmul.mubr.msk.bf16.vlgmr.msra.gmra.mrb[8].mxu1 %vm903_vm2, %v3036_v36 }
 0x475   : > { %2615 = vmatprep.mubr.msk.bf16.mxu1 %vm2821_vm1, %v2820_v31  ;;  %2612 = vmatpush3.bf16.msra.mxu1 %v2734_v49 }
 0x476   : > { %2613 = vmatprep.subr.bf16.mxu1 %v2820_v31 }
 0x479   : > { %2614 = vmatpush3.bf16.msra.mxu1 %v2735_v50 }
 0x47a   : > { %2625 = vmatprep.subr.bf16.mxu1 %v2820_v31 }
 0x47c   : > { %2616 = vmatmul.mubr.msk.bf16.vlgmr.msra.gmra.mrb[12].mxu1 %vm903_vm2, %v3036_v36 }
 0x47d   : > { %2627 = vmatprep.mubr.msk.bf16.mxu1 %vm2821_vm1, %v2820_v31 }
 0x53b   : > { %v3121_v51 = vpop.f32.mrb[16].mxu0 }
 0x53c   : > { %v2593_v52 = vpop.f32.mrb[17].mxu0 }
 0x53d   : > { %v1296_v53 = vpop.f32.mrb[18].mxu0 }
 0x53e   : > { %v2594_v54 = vpop.f32.mrb[19].mxu0 }
 0x53f   : > { %v3123_v55 = vpop.f32.mrb[4].mxu1 }
 0x540   : > { %v1299_v56 = vpack.c.bf16 %v3121_v51, %v3123_v55  ;;  %v2587_v57 = vpop.f32.mrb[5].mxu1 }
 0x541   : > { %v1250_v58 = vpop.f32.mrb[6].mxu1 }
 0x542   : > { %v2588_v60 = vpop.f32.mrb[7].mxu1 }
 0x543   : > { %v1411_v61 = vpop.f32.mrb[20].mxu0 }
 0x544   : > { %v1412_v36 = vadd.f32 %v2441_v59, %v1411_v61  ;;  %v2609_v62 = vpop.f32.mrb[21].mxu0 }
 0x545   : > { %v1414_v63 = vpop.f32.mrb[22].mxu0 }
 0x546   : > { %v1479_v1 = vpack.c.bf16 %v1412_v36, %v1412_v36  ;;  %v1415_v2 = vadd.f32 %v2441_v59, %v1414_v63  ;;  %v2610_v3 = vpop.f32.mrb[23].mxu0  ;;  %v2737_v36 = vld [vmem:[%s3337_s17 + $0x8] sm:$0xff]  }
 0x547   : > { %v1352_v4 = vpop.f32.mrb[8].mxu1 }
 0x548   : > { %v1487_v5 = vsel %vm1072_vm3, %v1479_v1, 0  ;;  %v1480_v6 = vpack.c.bf16 %v1415_v2, %v1415_v2  ;;  %v1353_v7 = vadd.f32 %v2437_v0, %v1352_v4  ;;  %v2601_v8 = vpop.f32.mrb[9].mxu1 }
 0x549   : > { %2620 = vmatpush3.bf16.xpose.msra.mxu0 %v1487_v5  ;;  %v1355_v9 = vpop.f32.mrb[10].mxu1 }
 0x54a   : > { %v1533_v10 = vsel %vm1072_vm3, %v1480_v6, 0  ;;  %v2602_v12 = vpop.f32.mrb[11].mxu1  ;;  %2631 = vmatprep.subr.bf16.mxu0 %v2820_v31  ;;  %v1477_v13 = vpack.c.bf16 %v1353_v7, %v1353_v7  ;;  %v1356_v14 = vadd.f32 %v2437_v0, %v1355_v9  ;;  %v2736_v0 = vld [vmem:[%s3337_s17] sm:$0xff]   ;;  %s3344_s17 = sld [smem:[#allocation17_spill]] (!%p2475_p5) }
 0x54b   : > { %2626 = vmatpush3.bf16.xpose.msra.mxu1 %v1533_v10 }
 0x54c   : > { %2637 = vmatprep.subr.bf16.mxu1 %v2820_v31  ;;  %v1478_v15 = vpack.c.bf16 %v1356_v14, %v1356_v14  ;;  %v2457_v14 = vld [vmem:[%s3338_s18] ss:$0 sm:$0xff] }
 0x54f   : > { %v1470_v18 = vpop.f32.mrb[12].mxu1 }
 0x550   : > { %2622 = vmatmul.mubr.msk.bf16.vlgmr.msra.gmra.mrb[24].mxu0 %vm1072_vm3, %v1477_v13  ;;  %v1471_v19 = vadd.f32 %v2445_v16, %v1470_v18  ;;  %v2617_v20 = vpop.f32.mrb[13].mxu1 }
 0x551   : > { %2633 = vmatprep.mubr.msk.bf16.mxu0 %vm2821_vm1, %v2820_v31  ;;  %v1473_v21 = vpop.f32.mrb[14].mxu1 }
 0x552   : > { %2628 = vmatmul.mubr.msk.bf16.vlgmr.msra.gmra.mrb[16].mxu1 %vm1072_vm3, %v1478_v15  ;;  %v1481_v22 = vpack.c.bf16 %v1471_v19, %v1471_v19  ;;  %v1474_v23 = vadd.f32 %v2445_v16, %v1473_v21  ;;  %v2618_v24 = vpop.f32.mrb[15].mxu1 }
 0x553   : > { %2639 = vmatprep.mubr.msk.bf16.mxu1 %vm2821_vm1, %v2820_v31 }
 0x554   : > { %v1607_v25 = vsel %vm1209_vm4, %v1481_v22, 0  ;;  %v1482_v26 = vpack.c.bf16 %v1474_v23, %v1474_v23 }
 0x555   : > { %2632 = vmatpush3.bf16.msra.mxu0 %v1607_v25 }
 0x556   : > { %v1653_v27 = vsel %vm1209_vm4, %v1482_v26, 0  ;;  %2643 = vmatprep.subr.bf16.mxu0 %v2820_v31 }
 0x557   : > { %2638 = vmatpush3.bf16.msra.mxu1 %v1653_v27 }
 0x558   : > { %2649 = vmatprep.subr.bf16.mxu1 %v2820_v31 }
 0x623   : > { %v1523_v28 = vpop.f32.mrb[24].mxu0 }
 0x624   : > { %v1575_v29 = vmul.f32 0.25, %v1523_v28  ;;  %v2623_v30 = vpop.f32.mrb[25].mxu0 }
 0x625   : > { %v1526_v32 = vpop.f32.mrb[26].mxu0  ;;  %v1569_v35 = vpop.f32.mrb[16].mxu1 }
 0x626   : > { %v1576_v37 = vmul.f32 0.25, %v1569_v35  ;;  %v2624_v38 = vpop.f32.mrb[27].mxu0  ;;  %v2629_v39 = vpop.f32.mrb[17].mxu1  ;;  %v1577_v40 = vadd.f32 %v3083_v17, %v1575_v29 }
 0x627   : > { %v1572_v41 = vpop.f32.mrb[18].mxu1 }
 0x628   : > { %v2630_v42 = vpop.f32.mrb[19].mxu1  ;;  %v1579_v43 = vsel %vm1181_vm5, %v1577_v40, -inf  ;;  %v1578_v44 = vadd.f32 %v3078_v11, %v1576_v37 }
 0x629   : > { %1580 = vmax.xlane.f32.xlu0 %v1579_v43 }
 0x62a   : > { %v1582_v45 = vsel %vm1181_vm5, %v1578_v44, -inf }
 0x62b   : > { %1583 = vmax.xlane.f32.xlu1 %v1582_v45 }
 0x6b6   : > { %v1581_v46 = vpop.xlane.xlu0 %1580 }
 0x6b7   : > { %v1585_v47 = vsub.f32 %v1577_v40, %v1581_v46  ;;  %v2739_v40 = vld [vmem:[%s2977_s4 + $0x8] sm:$0xff]  }
 0x6b8   : > { %v1584_v48 = vpop.xlane.xlu1 %1583 }
 0x6b9   : > { %v1587_v49 = vmul.f32 1.442695, %v1585_v47  ;;  %v1586_v50 = vsub.f32 %v1578_v44, %v1584_v48  ;;  %v2458_v48 = vld [vmem:[%s3339_s24] ss:$0 sm:$0xff] }
 0x6bb   : > { %2756 = vpow2.f32 %v1587_v49  ;;  %v1589_v52 = vmul.f32 1.442695, %v1586_v50 }
 0x6bd   : > { %2758 = vpow2.f32 %v1589_v52 }
 0x6c5   : > { %v2757_v17 = vpop.eup %2756 }
 0x6c6   : > { %v1591_v53 = vsel %vm1181_vm5, %v2757_v17, 0.0 }
 0x6c7   : > { %v2759_v54 = vpop.eup %2758  ;;  %1592 = vadd.xlane.f32.xlu0 %v1591_v53  ;;  %v2459_v53 = vld [vmem:[%s3340_s0] ss:$0 sm:$0xff] }
 0x6c8   : > { %v1594_v11 = vsel %vm1181_vm5, %v2759_v54, 0.0 }
 0x6c9   : > { %1595 = vadd.xlane.f32.xlu1 %v1594_v11 }
 0x754   : > { %v1593_v57 = vpop.xlane.xlu0 %1592 }
 0x755   : > { %2760 = vrcp.f32 %v1593_v57 }
 0x756   : > { %v1596_v58 = vpop.xlane.xlu1 %1595 }
 0x757   : > { %2762 = vrcp.f32 %v1596_v58 }
 0x75f   : > { %v2761_v59 = vpop.eup %2760 }
 0x760   : > { %v1599_v60 = vmul.f32 %v2761_v59, %v2757_v17  ;;  %v2740_v59 = vld [vmem:[%s2987_s1] sm:$0xff]  }
 0x761   : > { %v2763_v61 = vpop.eup %2762 }
 0x762   : > { %v1600_v62 = vmul.f32 %v2763_v61, %v2759_v54  ;;  %v1601_v63 = vpack.c.bf16 %v1599_v60, %v1599_v60  ;;  %v2741_v60 = vld [vmem:[%s2987_s1 + $0x8] sm:$0xff]   ;;  %v2742_v61 = vld [vmem:[%s2987_s1 + $0x10] sm:$0xff]  }
 0x764   : > { %2634 = vmatmul.mubr.msk.bf16.vlgmr.msra.gmra.mrb[28].mxu0 %vm1181_vm5, %v1601_v63  ;;  %v1602_v1 = vpack.c.bf16 %v1600_v62, %v1600_v62  ;;  %v2744_v62 = vld [vmem:[%s2987_s1 + $0x20] sm:$0xff]   ;;  %v2745_v63 = vld [vmem:[%s2987_s1 + $0x28] sm:$0xff]  }
 0x765   : > { %2644 = vmatpush3.bf16.msra.mxu0 %v2737_v36  ;;  %2645 = vmatprep.mubr.msk.bf16.mxu0 %vm2821_vm1, %v2820_v31  ;;  %v2743_v36 = vld [vmem:[%s2987_s1 + $0x18] sm:$0xff]  }
 0x766   : > { %2640 = vmatmul.mubr.msk.bf16.vlgmr.msra.gmra.mrb[20].mxu1 %vm1181_vm5, %v1602_v1  ;;  %2655 = vmatprep.subr.bf16.mxu0 %v2820_v31  ;;  %v2747_v1 = vld [vmem:[%s2987_s1 + $0x38] sm:$0xff]  }
 0x767   : > { %2650 = vmatpush3.bf16.msra.mxu1 %v2736_v0  ;;  %2651 = vmatprep.mubr.msk.bf16.mxu1 %vm2821_vm1, %v2820_v31  ;;  %v2746_v0 = vld [vmem:[%s2987_s1 + $0x30] sm:$0xff]   ;;  %s3343_s1 = sld [smem:[#allocation15_spill]] (!%p2475_p5) }
 0x768   : > { %2663 = vmatprep.subr.bf16.mxu1 %v2820_v31 }
 0x76e   : > { %2652 = vmatmul.mubr.msk.bf16.vlgmr.msra.gmra.mrb[24].mxu1 %vm1072_vm3, %v1299_v56 }
 0x76f   : > { %2679 = vmatprep.mubr.msk.bf16.mxu1 %vm2821_vm1, %v2820_v31  ;;  %2664 = vmatpush3.bf16.msra.mxu1 %v2740_v59 }
 0x770   : > { %2665 = vmatprep.subr.bf16.mxu1 %v2820_v31 }
 0x773   : > { %2666 = vmatpush3.bf16.msra.mxu1 %v2741_v60  ;;  %v2474_v60 = vld [vmem:[%s790_s3] ss:$0 sm:$0xff] }
 0x774   : > { %2667 = vmatprep.subr.bf16.mxu1 %v2820_v31 }
 0x777   : > { %2668 = vmatpush3.bf16.msra.mxu1 %v2742_v61 }
 0x778   : > { %2669 = vmatprep.subr.bf16.mxu1 %v2820_v31 }
 0x77b   : > { %2670 = vmatpush3.bf16.msra.mxu1 %v2743_v36 }
 0x77c   : > { %2671 = vmatprep.subr.bf16.mxu1 %v2820_v31 }
 0x77f   : > { %2672 = vmatpush3.bf16.msra.mxu1 %v2744_v62 }
 0x780   : > { %2673 = vmatprep.subr.bf16.mxu1 %v2820_v31 }
 0x783   : > { %2674 = vmatpush3.bf16.msra.mxu1 %v2745_v63 }
 0x784   : > { %2675 = vmatprep.subr.bf16.mxu1 %v2820_v31 }
 0x787   : > { %2676 = vmatpush3.bf16.msra.mxu1 %v2746_v0 }
 0x788   : > { %2677 = vmatprep.subr.bf16.mxu1 %v2820_v31 }
 0x78b   : > { %2678 = vmatpush3.bf16.msra.mxu1 %v2747_v1  ;;  %v2776_v1 = vld [vmem:[%s3341_s26] sm:$0xff] (!%p2475_p5)  }
 0x837   : > { %v1643_v2 = vpop.f32.mrb[28].mxu0 }
 0x838   : > { %v2635_v3 = vpop.f32.mrb[29].mxu0 }
 0x839   : > { %v1646_v4 = vpop.f32.mrb[30].mxu0  ;;  %v1689_v5 = vpop.f32.mrb[20].mxu1 }
 0x83a   : > { %v1695_v6 = vpack.c.bf16 %v1689_v5, %v1643_v2  ;;  %v2636_v7 = vpop.f32.mrb[31].mxu0  ;;  %v2641_v8 = vpop.f32.mrb[21].mxu1  ;;  %v2460_v2 = vld [vmem:[%s776_s21] ss:$0 sm:$0xff] }
 0x83b   : > { %v1692_v9 = vpop.f32.mrb[22].mxu1 }
 0x83c   : > { %v2642_v10 = vpop.f32.mrb[23].mxu1  ;;  %2646 = vmatmul.mubr.msk.bf16.vlgmr.msra.gmra.mrb[32].mxu0 %vm1072_vm3, %v1695_v6 }
 0x83d   : > { %2659 = vmatprep.mubr.msk.bf16.mxu0 %vm2821_vm1, %v2820_v31 }
 0x841   : > { %v1789_v51 = vpop.f32.mrb[24].mxu1 }
 0x842   : > { %v2653_v55 = vpop.f32.mrb[25].mxu1 }
 0x843   : > { %v1792_v56 = vpop.f32.mrb[26].mxu1 }
 0x844   : > { %v2654_v12 = vpop.f32.mrb[27].mxu1 }
 0x90f   : > { %v1739_v13 = vpop.f32.mrb[32].mxu0 }
 0x910   : > { %v1790_v15 = vadd.f32 %v1789_v51, %v1739_v13  ;;  %v2647_v16 = vpop.f32.mrb[33].mxu0 }
 0x911   : > { %v1742_v18 = vpop.f32.mrb[34].mxu0 }
 0x912   : > { %v1803_v19 = vadd.f32 %v2457_v14, %v1790_v15  ;;  %v1793_v20 = vadd.f32 %v1792_v56, %v1742_v18  ;;  %v2648_v21 = vpop.f32.mrb[35].mxu0 }
 0x914   : > { %v1804_v22 = vadd.f32 %v2457_v14, %v1793_v20  ;;  %v1805_v23 = vadd.f32 %v1803_v19, %v3026_v33 }
 0x916   : > { %v1809_v24 = vsel %vm903_vm2, %v1805_v23, 0.0  ;;  %v1806_v25 = vadd.f32 %v1804_v22, %v3028_v34  ;;  %v2738_v34 = vld [vmem:[%s2977_s4] sm:$0xff]   ;;  %s3342_s4 = sld [smem:[#allocation16_spill]] (!%p2475_p5) }
 0x917   : > { %1810 = vadd.xlane.f32.xlu0 %v1809_v24  ;;  %2656 = vmatpush3.bf16.msra.mxu0 %v2738_v34 }
 0x918   : > { %v1812_v26 = vsel %vm903_vm2, %v1806_v25, 0.0  ;;  %2657 = vmatprep.subr.bf16.mxu0 %v2820_v31 }
 0x919   : > { %1813 = vadd.xlane.f32.xlu1 %v1812_v26  ;;  %v2464_v26 = vld [vmem:[%s784_s6] ss:$0 sm:$0xff] }
 0x91b   : > { %2658 = vmatpush3.bf16.msra.mxu0 %v2739_v40 }
 0x9a4   : > { %v1811_v27 = vpop.xlane.xlu0 %1810 }
 0x9a5   : > { %v1816_v28 = vmul.f32 0.03125, %v1811_v27 }
 0x9a6   : > { %v1814_v29 = vpop.xlane.xlu1 %1813 }
 0x9a7   : > { %v1818_v30 = vsub.f32 %v1805_v23, %v1816_v28  ;;  %v1817_v32 = vmul.f32 0.03125, %v1814_v29 }
 0x9a9   : > { %v1819_v35 = vsub.f32 %v1806_v25, %v1817_v32  ;;  %v1820_v37 = vmul.f32 %v1818_v30, %v1818_v30 }
 0x9ab   : > { %v1822_v38 = vsel %vm903_vm2, %v1820_v37, 0.0  ;;  %v1821_v33 = vmul.f32 %v1819_v35, %v1819_v35 }
 0x9ac   : > { %1823 = vadd.xlane.f32.xlu0 %v1822_v38 }
 0x9ad   : > { %v1825_v39 = vsel %vm903_vm2, %v1821_v33, 0.0 }
 0x9ae   : > { %1826 = vadd.xlane.f32.xlu1 %v1825_v39 }
 0xa39   : > { %v1824_v41 = vpop.xlane.xlu0 %1823 }
 0xa3a   : > { %v1828_v42 = vmul.f32 0.03125, %v1824_v41 }
 0xa3b   : > { %v1827_v43 = vpop.xlane.xlu1 %1826 }
 0xa3c   : > { %v1830_v44 = vadd.f32 1e-12, %v1828_v42  ;;  %v1829_v45 = vmul.f32 0.03125, %v1827_v43 }
 0xa3e   : > { %2764 = vrsqrt.f32 %v1830_v44  ;;  %v1831_v46 = vadd.f32 1e-12, %v1829_v45 }
 0xa40   : > { %2766 = vrsqrt.f32 %v1831_v46 }
 0xa48   : > { %v2765_v47 = vpop.eup %2764 }
 0xa49   : > { %v1834_v49 = vmul.f32 %v2765_v47, %v1818_v30 }
 0xa4a   : > { %v2767_v50 = vpop.eup %2766 }
 0xa4b   : > { %v1842_v52 = vmul.f32 %v2458_v48, %v1834_v49  ;;  %v1835_v17 = vmul.f32 %v2767_v50, %v1819_v35 }
 0xa4d   : > { %v1843_v54 = vmul.f32 %v2458_v48, %v1835_v17  ;;  %v3193_v11 = vadd.f32 %v2459_v53, %v1842_v52 }
 0xa4f   : > { %v3195_v57 = vadd.f32 %v2459_v53, %v1843_v54 }
 0xa51   : > { %v1852_v58 = vpack.c.bf16 %v3195_v57, %v3193_v11 }
 0xa53   : > { %2660 = vmatmul.mubr.msk.bf16.vlgmr.msra.gmra.mrb[36].mxu0 %vm903_vm2, %v1852_v58 }
 0xb26   : > { %v1913_v3 = vpop.f32.mrb[36].mxu0 }
 0xb27   : > { %v1914_v4 = vadd.f32 %v2460_v2, %v1913_v3  ;;  %v2661_v5 = vpop.f32.mrb[37].mxu0 }
 0xb28   : > { %v1916_v6 = vpop.f32.mrb[38].mxu0  ;;  %v2777_v5 = vld [vmem:[%s3341_s26 + $0x8] sm:$0xff] (!%p2475_p5)  }
 0xb29   : > { %v1922_v7 = vmul.f32 0.044715, %v1914_v4  ;;  %v1917_v8 = vadd.f32 %v2460_v2, %v1916_v6  ;;  %v2662_v9 = vpop.f32.mrb[39].mxu0  ;;  %v1920_v20 = vmul.f32 0.5, %v1914_v4 }
 0xb2b   : > { %v1924_v10 = vmul.f32 %v1922_v7, %v1914_v4  ;;  %v1923_v51 = vmul.f32 0.044715, %v1917_v8  ;;  %v1921_v21 = vmul.f32 0.5, %v1917_v8 }
 0xb2d   : > { %v1926_v55 = vmul.f32 %v1924_v10, %v1914_v4  ;;  %v1925_v56 = vmul.f32 %v1923_v51, %v1917_v8  ;;  %v2778_v51 = vld [vmem:[%s3342_s4] sm:$0xff] (!%p2475_p5)  }
 0xb2f   : > { %v1928_v12 = vadd.f32 %v1926_v55, %v1914_v4  ;;  %v1927_v13 = vmul.f32 %v1925_v56, %v1917_v8  ;;  %v2822_v4 = vmov (!%p2475_p5), 0.0   ;;  %v2779_v55 = vld [vmem:[%s3342_s4 + $0x8] sm:$0xff] (!%p2475_p5)   ;;  %v2476_v56 = vld [vmem:[%s3343_s1] ss:$0 sm:$0xff] (!%p2475_p5) }
 0xb30   : > { %2683 = vmatprep.subr.bf16.mxu0 (!%p2475_p5), %v2822_v4  ;;  %2691 = vmatprep.subr.bf16.mxu1 (!%p2475_p5), %v2822_v4 }
 0xb31   : > { %v1930_v31 = vmul.f32 0.7978846, %v1928_v12  ;;  %v1929_v14 = vadd.f32 %v1927_v13, %v1917_v8  ;;  %2684 = vmatpush3.bf16.msra.mxu0 (!%p2475_p5), %v2776_v1  ;;  %2687 = vmatprep.mubr.msk.bf16.mxu0 (!%p2475_p5), %vm2823_vm6, %v2822_v4 }
 0xb32   : > { %2685 = vmatprep.subr.bf16.mxu0 (!%p2475_p5), %v2822_v4 }
 0xb33   : > { %2768 = vtanh.f32 %v1930_v31  ;;  %v1931_v15 = vmul.f32 0.7978846, %v1929_v14 }
 0xb35   : > { %2770 = vtanh.f32 %v1931_v15  ;;  %2686 = vmatpush3.bf16.msra.mxu0 (!%p2475_p5), %v2777_v5 }
 0xb3d   : > { %v2769_v16 = vpop.eup %2768 }
 0xb3e   : > { %v1934_v18 = vadd.f32 1.0, %v2769_v16 }
 0xb3f   : > { %v2771_v19 = vpop.eup %2770 }
 0xb40   : > { %v1935_v22 = vadd.f32 1.0, %v2771_v19  ;;  %v1936_v23 = vmul.f32 %v1934_v18, %v1920_v20  ;;  %v2480_v19 = vld [vmem:[%s3344_s17] ss:$0 sm:$0xff] (!%p2475_p5) }
 0xb42   : > { %v1937_v24 = vmul.f32 %v1935_v22, %v1921_v21 }
 0xb44   : > { %v1938_v25 = vpack.c.bf16 %v1937_v24, %v1936_v23 }
 0xb46   : > { %2680 = vmatmul.mubr.bf16.vlgmr.msra.gmra.mrb[28].mxu1 %v1938_v25 }
 0xb47   : > { %2695 = vmatprep.mubr.msk.bf16.mxu1 (!%p2475_p5), %vm2823_vm6, %v2822_v4  ;;  %2692 = vmatpush3.bf16.msra.mxu1 (!%p2475_p5), %v2778_v51 }
 0xb48   : > { %2693 = vmatprep.subr.bf16.mxu1 (!%p2475_p5), %v2822_v4 }
 0xb4b   : > { %2694 = vmatpush3.bf16.msra.mxu1 (!%p2475_p5), %v2779_v55 }
 0xc19   : > { %v2044_v27 = vpop.f32.mrb[28].mxu1 }
 0xc1a   : > { %v2045_v28 = vadd.f32 %v2464_v26, %v2044_v27  ;;  %v2681_v29 = vpop.f32.mrb[29].mxu1 }
 0xc1b   : > { %v2047_v30 = vpop.f32.mrb[30].mxu1 }
 0xc1c   : > { %v2048_v32 = vadd.f32 %v2464_v26, %v2047_v30  ;;  %v2682_v35 = vpop.f32.mrb[31].mxu1  ;;  %v2051_v37 = vadd.f32 %v2045_v28, %v3193_v11 }
 0xc1e   : > { %v2055_v38 = vsel %vm903_vm2, %v2051_v37, 0.0  ;;  %v2052_v33 = vadd.f32 %v2048_v32, %v3195_v57  ;;  %v2473_v57 = vld [vmem:[%s787_s28] ss:$0 sm:$0xff] }
 0xc1f   : > { %2056 = vadd.xlane.f32.xlu0 %v2055_v38 }
 0xc20   : > { %v2058_v39 = vsel %vm903_vm2, %v2052_v33, 0.0 }
 0xc21   : > { %2059 = vadd.xlane.f32.xlu1 %v2058_v39 }
 0xcac   : > { %v2057_v34 = vpop.xlane.xlu0 %2056 }
 0xcad   : > { %v2061_v40 = vmul.f32 0.03125, %v2057_v34 }
 0xcae   : > { %v2060_v41 = vpop.xlane.xlu1 %2059 }
 0xcaf   : > { %v2063_v42 = vsub.f32 %v2051_v37, %v2061_v40  ;;  %v2062_v43 = vmul.f32 0.03125, %v2060_v41 }
 0xcb1   : > { %v2064_v44 = vsub.f32 %v2052_v33, %v2062_v43  ;;  %v2065_v45 = vmul.f32 %v2063_v42, %v2063_v42 }
 0xcb3   : > { %v2067_v46 = vsel %vm903_vm2, %v2065_v45, 0.0  ;;  %v2066_v47 = vmul.f32 %v2064_v44, %v2064_v44 }
 0xcb4   : > { %2068 = vadd.xlane.f32.xlu0 %v2067_v46 }
 0xcb5   : > { %v2070_v48 = vsel %vm903_vm2, %v2066_v47, 0.0 }
 0xcb6   : > { %2071 = vadd.xlane.f32.xlu1 %v2070_v48 }
 0xd41   : > { %v2069_v49 = vpop.xlane.xlu0 %2068 }
 0xd42   : > { %v2073_v50 = vmul.f32 0.03125, %v2069_v49 }
 0xd43   : > { %v2072_v52 = vpop.xlane.xlu1 %2071 }
 0xd44   : > { %v2075_v17 = vadd.f32 1e-12, %v2073_v50  ;;  %v2074_v53 = vmul.f32 0.03125, %v2072_v52 }
 0xd46   : > { %2772 = vrsqrt.f32 %v2075_v17  ;;  %v2076_v54 = vadd.f32 1e-12, %v2074_v53 }
 0xd48   : > { %2774 = vrsqrt.f32 %v2076_v54 }
 0xd50   : > { %v2773_v11 = vpop.eup %2772 }
 0xd51   : > { %v2079_v58 = vmul.f32 %v2773_v11, %v2063_v42 }
 0xd52   : > { %v2775_v59 = vpop.eup %2774 }
 0xd53   : > { %v2087_v61 = vmul.f32 %v2473_v57, %v2079_v58  ;;  %v2080_v36 = vmul.f32 %v2775_v59, %v2064_v44  ;;  %2102 = sbr.rel (%p2475_p5) target bundleno = 3868 (0xf1c), region = 108 }
 0xd55   : > { %v2095_v62 = vadd.f32 %v2474_v60, %v2087_v61  ;;  %v2088_v63 = vmul.f32 %v2473_v57, %v2080_v36 }
 0xd57   : > { %2097 = vst.msk [vmem:[#allocation2] sm:$0xff] %vm903_vm2, %v2095_v62  ;;  %v2096_v0 = vadd.f32 %v2474_v60, %v2088_v63  ;;  %v2103_v2 = vpack.c.bf16 (!%p2475_p5), %v2095_v62, %v2095_v62 }
 0xd59   : > { %2098 = vst.msk [vmem:[#allocation2 + $0x8] sm:$0xff] %vm903_vm2, %v2096_v0  ;;  %v2104_v3 = vpack.c.bf16 (!%p2475_p5), %v2096_v0, %v2096_v0  ;;  %v2118_v6 = vunpack.c.l.b16 (!%p2475_p5), %v2103_v2 }
 0xd5b   : > { %v2119_v7 = vunpack.c.l.b16 %v2104_v3 }
 0xd5d   : > { %v2120_v8 = vrot.slane %v2119_v7, 7 }
 0xd5f   : > { %v2122_v9 = vsel %vm2121_vm7, %v2120_v8, %v2118_v6 }
 0xd60   : > { %v2123_v10 = vpack.c.b16 %v2122_v9, %v2122_v9 }
 0xd62   : > { %2688 = vmatmul.mubr.msk.bf16.vlgmr.msra.gmra.mrb[0].mxu0 %vm903_vm2, %v2123_v10 }
 0xe35   : > { %v2173_v12 = vpop.f32.mrb[0].mxu0 }
 0xe36   : > { %v2174_v13 = vadd.f32 %v2476_v56, %v2173_v12  ;;  %v2689_v31 = vpop.f32.mrb[1].mxu0 }
 0xe37   : > { %v2176_v14 = vpop.f32.mrb[2].mxu0 }
 0xe38   : > { %2780 = vtanh.f32 %v2174_v13  ;;  %v2690_v15 = vpop.f32.mrb[3].mxu0 }
 0xe42   : > { %v2781_v16 = vpop.eup %2780 }
 0xe43   : > { %v2180_v18 = vpack.c.bf16 %v2781_v16, %v2781_v16 }
 0xe45   : > { %2696 = vmatmul.mubr.msk.bf16.vlgmr.msra.gmra.mrb[0].mxu1 %vm903_vm2, %v2180_v18 }
 0xf18   : > { %v2241_v20 = vpop.f32.mrb[0].mxu1 }
 0xf19   : > { %v2242_v21 = vadd.f32 %v2480_v19, %v2241_v20  ;;  %v2697_v22 = vpop.f32.mrb[1].mxu1 }
 0xf1a   : > { %v2244_v23 = vpop.f32.mrb[2].mxu1 }
 0xf1b   : > { %2247 = vst [vmem:[#allocation3] sm:$0x3] %v2242_v21  ;;  %v2698_v24 = vpop.f32.mrb[3].mxu1 }
 0xf1c PF: > { %p2705_p6 = scmp.eq.s32.totalorder %s2936_s22, 1  ;;  %s2824_s30 = smov [#allocation3]  }
 0xf1d   : > { %s2255_s16 = sshll.u32 %s2824_s30, 4  ;;  %s2256_s16 = int_to_ptr.vmem [resolvable:$true] %s2255_s16 }
 0xf1e   : > { %s2782_s28 = scalar_lea.vmem %s2256_s16, 32  ;;  %p2789_p10 = scmp.lt.s32.totalorder %s2256_s16, %s2256_s16 }
 0xf1f   : > { %p2783_p7 = scmp.ne.s32.totalorder %s2256_s16, %s2782_s28  ;;  %p2790_p11 = scmp.lt.s32.totalorder %s2782_s28, %s2782_s28 }
 0xf21   : > { %p2784_p8 = pnand %p2783_p7, %p2705_p6  ;;  %p2791_p12 = por %p2790_p11, %p2789_p10 }
 0xf23   : > { %p2785_p9 = pneg %p2784_p8 }
 0xf25   : > { %p2792_p13 = pnand %p2791_p12, %p2785_p9 }
 0xf27   : > { %2795 = shalt.err (!%p2792_p13)
}
 0xf28   : > { %s3345_s3 = sld [smem:[#allocation18_spill]] }
 0xf2e   : > { %s2796_s2 = scalar_lea.hbm %s3345_s3, 32 }
 0xf2f   : > { %p2797_p0 = scmp.ne.s32.totalorder %s3345_s3, %s2796_s2  ;;  %p2802_p3 = scmp.lt.u32.totalorder %s2796_s2, %s3345_s3 }
 0xf31   : > { %p2798_p1 = pnand %p2797_p0, %p2705_p6 }
 0xf33   : > { %p2799_p2 = pneg %p2798_p1 }
 0xf35   : > { %p2804_p4 = pnand %p2802_p3, %p2799_p2 }
 0xf37   : > { %2807 = shalt.err (!%p2804_p4)
}
 0xf38   : > { %2702 = dma.vmem_to_hbm [thread:$0]  (%p2705_p6), %s2256_s16, 32, %s3345_s3, [#allocation4]  }
 0xf39   : > { %2813 = dma.done.wait (%p2705_p6), [#allocation4], 32  }
 0xf3a   : > { %2815 = vsyncadd (%p2705_p6), [#allocation4], 4294967264 }
 0xf3b PF: > { %s3346_s21 = sld [smem:[#allocation6_spill]] }
 0xf41   : > { %s31_s1 = sadd.s32 1, %s3346_s21  }
 0xf42   : > { %p28_p5 = scmp.ge.s32.totalorder %s31_s1, 4  }
 0xf44   :  { %30 = sbr.rel (!%p28_p5) target bundleno = 13 (0xd), region = 168 }
 0xf4b   :  { %2268 = vsyncpa [#allocation4], 1 }
 0xf4c   :  { %2270 = vsyncpa [#allocation4 + $0x1], 1 }

</bundles_post_ra>
